<compile_context>
chip_gen: v6e
topology: v6e:2x2x1
jax: 0.10.0
libtpu: 0.0.40
codegen_flags: <defaults>
</compile_context>

<pallas_src>
import functools
import math

import jax
import jax.numpy as jnp
from jax.experimental import pallas as pl
from jax.experimental.pallas import tpu as pltpu


# ----------------------------- config -------------------------------------
CFG = dict(
    vocab_size=128,
    context_length=16,
    emb_dim=32,
    n_heads=4,
    n_layers=2,
    drop_rate=0.0,
    qkv_bias=False,
)
BATCH = 2
SEQ = 8  # num_tokens <= context_length

_GELU_C = math.sqrt(2.0 / math.pi)


# ------------------------- in-kernel helpers -------------------------------
def _layernorm(x, scale, shift, eps=1e-5):
    mean = jnp.mean(x, axis=-1, keepdims=True)
    xc = x - mean
    var = jnp.mean(xc * xc, axis=-1, keepdims=True)      # unbiased=False
    return scale * (xc * jax.lax.rsqrt(var + eps)) + shift


def _gelu_tanh(x):
    return 0.5 * x * (1.0 + jnp.tanh(_GELU_C * (x + 0.044715 * x * x * x)))


# -------------------- fused full-model forward kernel ----------------------
def _gpt_kernel(num_heads,
                x_ref,
                ln1s_ref, ln1b_ref, wqkv_ref, wo_ref, bo_ref,
                ln2s_ref, ln2b_ref, w1_ref, b1_ref, w2_ref, b2_ref,
                fns_ref, fnb_ref, wout_ref,
                o_ref,
                xres_ref, ctx_ref):
    l = pl.program_id(1)
    H = num_heads

    # Initialize the residual stream carried across the layer grid axis.
    @pl.when(l == 0)
    def _():
        xres_ref[...] = x_ref[0].astype(jnp.float32)

    x = xres_ref[...]                                     # (T, D)
    T, D = x.shape
    hd = D // H

    # Causal additive mask (score scaling is pre-folded into the Q weights).
    row = jax.lax.broadcasted_iota(jnp.int32, (T, T), 0)
    col = jax.lax.broadcasted_iota(jnp.int32, (T, T), 1)
    neg_bias = jnp.where(col > row, jnp.float32(-1e30), jnp.float32(0.0))

    # --- norm1 + head-major QKV projection (no in-kernel lane slicing) ---
    h = _layernorm(x, ln1s_ref[0], ln1b_ref[0])
    h_b = jnp.broadcast_to(h[None], (3 * H, T, D))
    qkv_h = jnp.einsum("gtd,gde->gte", h_b, wqkv_ref[0],
                       preferred_element_type=jnp.float32)          # (3H, T, hd)
    q_h = qkv_h[:H]                                       # (H, T, hd), pre-scaled
    k_h = qkv_h[H:2 * H]
    v_h = qkv_h[2 * H:]

    # --- causal softmax attention, batched over heads ---
    s = jnp.einsum("hqd,hkd->hqk", q_h, k_h,
                   preferred_element_type=jnp.float32) + neg_bias[None]
    m = jnp.max(s, axis=-1, keepdims=True)
    p = jnp.exp(s - m)
    p = p * pl.reciprocal(jnp.sum(p, axis=-1, keepdims=True), approx=True)
    ctx_h = jnp.einsum("hqk,hkd->hqd", p, v_h,
                       preferred_element_type=jnp.float32)          # (H, T, hd)

    # --- reassemble heads lane-dense, then ONE full-K output projection ---
    for hh in range(H):                                   # H masked lane stores
        ctx_ref[:, hh * hd:(hh + 1) * hd] = ctx_h[hh]
    attn = jnp.dot(ctx_ref[...], wo_ref[0],
                   preferred_element_type=jnp.float32) + bo_ref[0]
    x = x + attn                                          # residual 1 (dropout = id)

    # --- norm2 + GELU feed-forward ---
    h2 = _layernorm(x, ln2s_ref[0], ln2b_ref[0])
    f = jnp.dot(h2, w1_ref[0], preferred_element_type=jnp.float32) + b1_ref[0]
    f = _gelu_tanh(f)
    f = jnp.dot(f, w2_ref[0], preferred_element_type=jnp.float32) + b2_ref[0]
    x = x + f                                             # residual 2
    xres_ref[...] = x

    # --- last layer: final LayerNorm + vocab projection (lane-dense V) ---
    @pl.when(l == pl.num_programs(1) - 1)
    def _():
        hf = _layernorm(x, fns_ref[...], fnb_ref[...])
        o_ref[0] = jnp.dot(hf, wout_ref[...],
                           preferred_element_type=jnp.float32).astype(o_ref.dtype)


# ------------------------------ wrapper ------------------------------------
def gpt_forward(params, in_idx, cfg):
    B, T = in_idx.shape
    D, H, L, V = cfg["emb_dim"], cfg["n_heads"], cfg["n_layers"], cfg["vocab_size"]
    hd = D // H

    # Embedding gather + positional add: plain-JAX glue (data-dependent gather).
    tok = params["tok_emb"][in_idx]                       # (B, T, D)
    pos = params["pos_emb"][jnp.arange(T)]                # (T, D)
    x = tok + pos[None, :, :]
    # drop_emb: identity (eval / drop_rate = 0.0)

    # Host-side (free) re-layout: head-major QKV blocks, g = qkv_idx * H + head,
    # with 1/sqrt(head_dim) folded into the Q blocks (g < H).
    wqkv_h = (params["wqkv"]
              .reshape(L, D, 3, H, hd)
              .transpose(0, 2, 3, 1, 4)                   # (L, 3, H, D, hd)
              .reshape(L, 3 * H, D, hd))
    qscale = jnp.concatenate([jnp.full((H,), hd ** -0.5, jnp.float32),
                              jnp.ones((2 * H,), jnp.float32)])
    wqkv_h = wqkv_h * qscale[None, :, None, None]

    layer_args = (
        params["ln1s"], params["ln1b"], wqkv_h, params["wo"], params["bo"],
        params["ln2s"], params["ln2b"], params["w1"], params["b1"],
        params["w2"], params["b2"],
    )
    const_args = (params["fns"], params["fnb"], params["out_head"])

    def layer_spec(arr):                                  # streamed: one layer/step
        nd = arr.ndim
        return pl.BlockSpec((1,) + arr.shape[1:],
                            lambda b, l, _nd=nd: (l,) + (0,) * (_nd - 1))

    def const_spec(arr):                                  # resident across the grid
        nd = arr.ndim
        return pl.BlockSpec(arr.shape, lambda b, l, _nd=nd: (0,) * _nd)

    in_specs = [pl.BlockSpec((1, T, D), lambda b, l: (b, 0, 0))]
    in_specs += [layer_spec(a) for a in layer_args]
    in_specs += [const_spec(a) for a in const_args]

    return pl.pallas_call(
        functools.partial(_gpt_kernel, H),
        out_shape=jax.ShapeDtypeStruct((B, T, V), jnp.float32),
        grid=(B, L),
        in_specs=in_specs,
        out_specs=pl.BlockSpec((1, T, V), lambda b, l: (b, 0, 0)),
        scratch_shapes=[pltpu.VMEM((T, D), jnp.float32),   # residual stream
                        pltpu.VMEM((T, D), jnp.float32)],  # ctx reassembly
        compiler_params=pltpu.CompilerParams(
            dimension_semantics=("parallel", "arbitrary")),
    )(x, *layer_args, *const_args)


# -------------------------- parameter init ---------------------------------
def init_params(cfg, key):
    D, V, C = cfg["emb_dim"], cfg["vocab_size"], cfg["context_length"]
    L, H4 = cfg["n_layers"], 4 * cfg["emb_dim"]
    keys = jax.random.split(key, 7)
    nrm = lambda k, shape: jax.random.normal(k, shape, jnp.float32) * 0.02

    return dict(
        tok_emb=nrm(keys[0], (V, D)),
        pos_emb=nrm(keys[1], (C, D)),
        ln1s=jnp.ones((L, 1, D), jnp.float32), ln1b=jnp.zeros((L, 1, D), jnp.float32),
        wqkv=nrm(keys[2], (L, D, 3 * D)),                 # fused [Wq | Wk | Wv]
        wo=nrm(keys[3], (L, D, D)), bo=jnp.zeros((L, 1, D), jnp.float32),
        ln2s=jnp.ones((L, 1, D), jnp.float32), ln2b=jnp.zeros((L, 1, D), jnp.float32),
        w1=nrm(keys[4], (L, D, H4)), b1=jnp.zeros((L, 1, H4), jnp.float32),
        w2=nrm(keys[5], (L, H4, D)), b2=jnp.zeros((L, 1, D), jnp.float32),
        fns=jnp.ones((1, D), jnp.float32), fnb=jnp.zeros((1, D), jnp.float32),
        out_head=nrm(keys[6], (D, V)),
    )


# ------------------------- pure-JAX reference -------------------------------
def _ref_forward(params, in_idx, cfg):
    def ln(x, s, b):
        m = x.mean(-1, keepdims=True)
        v = ((x - m) ** 2).mean(-1, keepdims=True)
        return s * ((x - m) / jnp.sqrt(v + 1e-5)) + b

    B, T = in_idx.shape
    D, H, L = cfg["emb_dim"], cfg["n_heads"], cfg["n_layers"]
    hd = D // H
    x = params["tok_emb"][in_idx] + params["pos_emb"][jnp.arange(T)][None]
    causal = jnp.triu(jnp.ones((T, T), bool), k=1)
    for l in range(L):
        h = ln(x, params["ln1s"][l, 0], params["ln1b"][l, 0])
        qkv = h @ params["wqkv"][l]
        q, k, v = qkv[..., :D], qkv[..., D:2 * D], qkv[..., 2 * D:]
        q = q.reshape(B, T, H, hd).transpose(0, 2, 1, 3)
        k = k.reshape(B, T, H, hd).transpose(0, 2, 1, 3)
        v = v.reshape(B, T, H, hd).transpose(0, 2, 1, 3)
        s = jnp.einsum("bhqd,bhkd->bhqk", q, k)
        s = jnp.where(causal[None, None], -jnp.inf, s) / jnp.sqrt(jnp.float32(hd))
        p = jax.nn.softmax(s, axis=-1)
        ctx = jnp.einsum("bhqk,bhkd->bhqd", p, v).transpose(0, 2, 1, 3).reshape(B, T, D)
        x = x + (ctx @ params["wo"][l] + params["bo"][l, 0])
        h2 = ln(x, params["ln2s"][l, 0], params["ln2b"][l, 0])
        f = h2 @ params["w1"][l] + params["b1"][l, 0]
        f = 0.5 * f * (1 + jnp.tanh(jnp.sqrt(2.0 / jnp.pi) * (f + 0.044715 * f ** 3)))
        x = x + (f @ params["w2"][l] + params["b2"][l, 0])
    x = ln(x, params["fns"][0], params["fnb"][0])
    return x @ params["out_head"]


# --------------------------------- main --------------------------------------
if __name__ == "__main__":
    key = jax.random.PRNGKey(0)
    k_param, k_idx = jax.random.split(key)

    params = init_params(CFG, k_param)
    in_idx = jax.random.randint(k_idx, (BATCH, SEQ), 0, CFG["vocab_size"], jnp.int32)

    logits = gpt_forward(params, in_idx, CFG)
    logits = jax.block_until_ready(logits)

    assert logits.shape == (BATCH, SEQ, CFG["vocab_size"]), logits.shape

    ref = _ref_forward(params, in_idx, CFG)
    max_err = float(jnp.max(jnp.abs(logits - ref)))
    assert jnp.allclose(logits, ref, atol=2e-3, rtol=2e-3), max_err

    print("KERNEL_OK")
</pallas_src>

<mosaic_0001>
module attributes {stable_mosaic.version = 11 : i64} {
  func.func @_gpt_kernel(%arg0: i32, %arg1: i32, %arg2: memref<1x8x32xf32, #tpu.memory_space<vmem>>, %arg3: memref<1x1x32xf32, #tpu.memory_space<vmem>>, %arg4: memref<1x1x32xf32, #tpu.memory_space<vmem>>, %arg5: memref<1x12x32x8xf32, #tpu.memory_space<vmem>>, %arg6: memref<1x32x32xf32, #tpu.memory_space<vmem>>, %arg7: memref<1x1x32xf32, #tpu.memory_space<vmem>>, %arg8: memref<1x1x32xf32, #tpu.memory_space<vmem>>, %arg9: memref<1x1x32xf32, #tpu.memory_space<vmem>>, %arg10: memref<1x32x128xf32, #tpu.memory_space<vmem>>, %arg11: memref<1x1x128xf32, #tpu.memory_space<vmem>>, %arg12: memref<1x128x32xf32, #tpu.memory_space<vmem>>, %arg13: memref<1x1x32xf32, #tpu.memory_space<vmem>>, %arg14: memref<1x32xf32, #tpu.memory_space<vmem>>, %arg15: memref<1x32xf32, #tpu.memory_space<vmem>>, %arg16: memref<32x128xf32, #tpu.memory_space<vmem>>, %arg17: memref<1x8x128xf32, #tpu.memory_space<vmem>>, %arg18: memref<8x32xf32, #tpu.memory_space<vmem>>, %arg19: memref<8x32xf32, #tpu.memory_space<vmem>>) attributes {dimension_semantics = [#tpu.dimension_semantics<parallel>, #tpu.dimension_semantics<arbitrary>], iteration_bounds = array<i64: 2, 2>, scalar_prefetch = 0 : i64, scratch_operands = 2 : i64, tpu.core_type = #tpu.core_type<tc>, window_params = [{transform_indices = @transform_0, window_bounds = array<i64: 1, 8, 32>}, {transform_indices = @transform_1, window_bounds = array<i64: 1, 1, 32>}, {transform_indices = @transform_2, window_bounds = array<i64: 1, 1, 32>}, {transform_indices = @transform_3, window_bounds = array<i64: 1, 12, 32, 8>}, {transform_indices = @transform_4, window_bounds = array<i64: 1, 32, 32>}, {transform_indices = @transform_5, window_bounds = array<i64: 1, 1, 32>}, {transform_indices = @transform_6, window_bounds = array<i64: 1, 1, 32>}, {transform_indices = @transform_7, window_bounds = array<i64: 1, 1, 32>}, {transform_indices = @transform_8, window_bounds = array<i64: 1, 32, 128>}, {transform_indices = @transform_9, window_bounds = array<i64: 1, 1, 128>}, {transform_indices = @transform_10, window_bounds = array<i64: 1, 128, 32>}, {transform_indices = @transform_11, window_bounds = array<i64: 1, 1, 32>}, {pipeline_mode = #tpu.pipeline_mode<synchronous>, transform_indices = @transform_12, window_bounds = array<i64: 1, 32>}, {pipeline_mode = #tpu.pipeline_mode<synchronous>, transform_indices = @transform_13, window_bounds = array<i64: 1, 32>}, {pipeline_mode = #tpu.pipeline_mode<synchronous>, transform_indices = @transform_14, window_bounds = array<i64: 32, 128>}, {transform_indices = @transform_15, window_bounds = array<i64: 1, 8, 128>}]} {
    %c0_i32 = arith.constant 0 : i32
    %0 = arith.cmpi eq, %arg1, %c0_i32 : i32
    %1 = arith.extui %0 : i1 to i32
    %c0_i32_0 = arith.constant 0 : i32
    %2 = arith.cmpi ne, %1, %c0_i32_0 : i32
    scf.if %2 {
      %c0_69 = arith.constant 0 : index
      %c0_70 = arith.constant 0 : index
      %c0_71 = arith.constant 0 : index
      %135 = vector.load %arg2[%c0_69, %c0_70, %c0_71] : memref<1x8x32xf32, #tpu.memory_space<vmem>>, vector<1x8x32xf32>
      %136 = vector.shape_cast %135 : vector<1x8x32xf32> to vector<8x32xf32>
      %c0_72 = arith.constant 0 : index
      %c0_73 = arith.constant 0 : index
      %137 = vector.load %arg18[%c0_72, %c0_73] : memref<8x32xf32, #tpu.memory_space<vmem>>, vector<8x32xf32>
      tpu.vector_store %arg18[%c0_72, %c0_73], %136 {strides = array<i32>} : memref<8x32xf32, #tpu.memory_space<vmem>>, vector<8x32xf32>,
    } else {
    }
    %c0 = arith.constant 0 : index
    %c0_1 = arith.constant 0 : index
    %3 = vector.load %arg18[%c0, %c0_1] : memref<8x32xf32, #tpu.memory_space<vmem>>, vector<8x32xf32>
    %4 = tpu.iota {dimensions = array<i32: 0>} : vector<8x8xi32>
    %5 = tpu.iota {dimensions = array<i32: 1>} : vector<8x8xi32>
    %6 = arith.cmpi sgt, %5, %4 : vector<8x8xi32>
    %cst = arith.constant -1.000000e+30 : f32
    %cst_2 = arith.constant 0.000000e+00 : f32
    %7 = vector.broadcast %cst : f32 to vector<8x8xf32>
    %8 = vector.broadcast %cst_2 : f32 to vector<8x8xf32>
    %9 = arith.select %6, %7, %8 : vector<8x8xi1>, vector<8x8xf32>
    %c0_3 = arith.constant 0 : index
    %c0_4 = arith.constant 0 : index
    %c0_5 = arith.constant 0 : index
    %10 = vector.load %arg3[%c0_3, %c0_4, %c0_5] : memref<1x1x32xf32, #tpu.memory_space<vmem>>, vector<1x1x32xf32>
    %11 = vector.shape_cast %10 : vector<1x1x32xf32> to vector<1x32xf32>
    %c0_6 = arith.constant 0 : index
    %c0_7 = arith.constant 0 : index
    %c0_8 = arith.constant 0 : index
    %12 = vector.load %arg4[%c0_6, %c0_7, %c0_8] : memref<1x1x32xf32, #tpu.memory_space<vmem>>, vector<1x1x32xf32>
    %13 = vector.shape_cast %12 : vector<1x1x32xf32> to vector<1x32xf32>
    %cst_9 = arith.constant dense<0.000000e+00> : vector<8xf32>
    %14 = vector.multi_reduction <add>, %3, %cst_9 [1] : vector<8x32xf32> to vector<8xf32>
    %15 = vector.shape_cast %14 : vector<8xf32> to vector<8x1xf32>
    %cst_10 = arith.constant 3.200000e+01 : f32
    %16 = vector.broadcast %cst_10 : f32 to vector<8x1xf32>
    %17 = arith.divf %15, %16 : vector<8x1xf32>
    %18 = vector.broadcast %17 : vector<8x1xf32> to vector<8x32xf32>
    %19 = arith.subf %3, %18 : vector<8x32xf32>
    %20 = arith.mulf %19, %19 : vector<8x32xf32>
    %cst_11 = arith.constant dense<0.000000e+00> : vector<8xf32>
    %21 = vector.multi_reduction <add>, %20, %cst_11 [1] : vector<8x32xf32> to vector<8xf32>
    %22 = vector.shape_cast %21 : vector<8xf32> to vector<8x1xf32>
    %cst_12 = arith.constant 3.200000e+01 : f32
    %23 = vector.broadcast %cst_12 : f32 to vector<8x1xf32>
    %24 = arith.divf %22, %23 : vector<8x1xf32>
    %cst_13 = arith.constant 9.99999974E-6 : f32
    %25 = vector.broadcast %cst_13 : f32 to vector<8x1xf32>
    %26 = arith.addf %24, %25 : vector<8x1xf32>
    %27 = math.rsqrt %26 : vector<8x1xf32>
    %28 = vector.broadcast %27 : vector<8x1xf32> to vector<8x32xf32>
    %29 = arith.mulf %19, %28 : vector<8x32xf32>
    %30 = vector.broadcast %11 : vector<1x32xf32> to vector<8x32xf32>
    %31 = arith.mulf %30, %29 : vector<8x32xf32>
    %32 = vector.broadcast %13 : vector<1x32xf32> to vector<8x32xf32>
    %33 = arith.addf %31, %32 : vector<8x32xf32>
    %34 = vector.shape_cast %33 : vector<8x32xf32> to vector<1x8x32xf32>
    %35 = vector.shape_cast %34 : vector<1x8x32xf32> to vector<1x8x32xf32>
    %36 = vector.broadcast %35 : vector<1x8x32xf32> to vector<12x8x32xf32>
    %c0_14 = arith.constant 0 : index
    %c0_15 = arith.constant 0 : index
    %c0_16 = arith.constant 0 : index
    %c0_17 = arith.constant 0 : index
    %37 = vector.load %arg5[%c0_14, %c0_15, %c0_16, %c0_17] : memref<1x12x32x8xf32, #tpu.memory_space<vmem>>, vector<1x12x32x8xf32>
    %38 = vector.shape_cast %37 : vector<1x12x32x8xf32> to vector<12x32x8xf32>
    "tpu.trace_start"() <{level = 10 : i32, message = "gtd,gde->gte"}> : () -> ()
    %cst_18 = arith.constant dense<0.000000e+00> : vector<12x8x8xf32>
    %39 = tpu.matmul %36, %38, %cst_18 {dimension_numbers = #tpu.dot_dimension_numbers<[2], [1], [1], [2], [0, 0, 0, 1, 1, 2], [0], [0]>} : vector<12x8x32xf32>, vector<12x32x8xf32>, vector<12x8x8xf32> -> vector<12x8x8xf32>
    "tpu.trace_stop"() : () -> ()
    %40 = vector.extract_strided_slice %39 {offsets = [0, 0, 0], sizes = [4, 8, 8], strides = [1, 1, 1]} : vector<12x8x8xf32> to vector<4x8x8xf32>
    %41 = vector.extract_strided_slice %39 {offsets = [4, 0, 0], sizes = [4, 8, 8], strides = [1, 1, 1]} : vector<12x8x8xf32> to vector<4x8x8xf32>
    %42 = vector.extract_strided_slice %39 {offsets = [8, 0, 0], sizes = [4, 8, 8], strides = [1, 1, 1]} : vector<12x8x8xf32> to vector<4x8x8xf32>
    "tpu.trace_start"() <{level = 10 : i32, message = "hqd,hkd->hqk"}> : () -> ()
    %cst_19 = arith.constant dense<0.000000e+00> : vector<4x8x8xf32>
    %43 = tpu.matmul %40, %41, %cst_19 {dimension_numbers = #tpu.dot_dimension_numbers<[2], [2], [1], [1], [0, 0, 0, 1, 1, 1], [0], [0]>} : vector<4x8x8xf32>, vector<4x8x8xf32>, vector<4x8x8xf32> -> vector<4x8x8xf32>
    "tpu.trace_stop"() : () -> ()
    %44 = vector.shape_cast %9 : vector<8x8xf32> to vector<1x8x8xf32>
    %45 = vector.broadcast %44 : vector<1x8x8xf32> to vector<4x8x8xf32>
    %46 = arith.addf %43, %45 : vector<4x8x8xf32>
    %cst_20 = arith.constant dense<0xFF800000> : vector<4x8xf32>
    %47 = vector.multi_reduction <maximumf>, %46, %cst_20 [2] : vector<4x8x8xf32> to vector<4x8xf32>
    %48 = vector.shape_cast %47 : vector<4x8xf32> to vector<4x8x1xf32>
    %49 = vector.broadcast %48 : vector<4x8x1xf32> to vector<4x8x8xf32>
    %50 = arith.subf %46, %49 : vector<4x8x8xf32>
    %51 = math.exp %50 : vector<4x8x8xf32>
    %cst_21 = arith.constant dense<0.000000e+00> : vector<4x8xf32>
    %52 = vector.multi_reduction <add>, %51, %cst_21 [2] : vector<4x8x8xf32> to vector<4x8xf32>
    %53 = vector.shape_cast %52 : vector<4x8xf32> to vector<4x8x1xf32>
    %54 = tpu.reciprocal %53 {approx = true} : vector<4x8x1xf32> -> vector<4x8x1xf32>
    %55 = vector.broadcast %54 : vector<4x8x1xf32> to vector<4x8x8xf32>
    %56 = arith.mulf %51, %55 : vector<4x8x8xf32>
    "tpu.trace_start"() <{level = 10 : i32, message = "hqk,hkd->hqd"}> : () -> ()
    %cst_22 = arith.constant dense<0.000000e+00> : vector<4x8x8xf32>
    %57 = tpu.matmul %56, %42, %cst_22 {dimension_numbers = #tpu.dot_dimension_numbers<[2], [1], [1], [2], [0, 0, 0, 1, 1, 2], [0], [0]>} : vector<4x8x8xf32>, vector<4x8x8xf32>, vector<4x8x8xf32> -> vector<4x8x8xf32>
    "tpu.trace_stop"() : () -> ()
    %58 = vector.extract_strided_slice %57 {offsets = [0, 0, 0], sizes = [1, 8, 8], strides = [1, 1, 1]} : vector<4x8x8xf32> to vector<1x8x8xf32>
    %59 = vector.shape_cast %58 : vector<1x8x8xf32> to vector<8x8xf32>
    %c0_23 = arith.constant 0 : index
    %c0_24 = arith.constant 0 : index
    %60 = vector.load %arg19[%c0_23, %c0_24] : memref<8x32xf32, #tpu.memory_space<vmem>>, vector<8x8xf32>
    tpu.vector_store %arg19[%c0_23, %c0_24], %59 {strides = array<i32>} : memref<8x32xf32, #tpu.memory_space<vmem>>, vector<8x8xf32>,
    %61 = vector.extract_strided_slice %57 {offsets = [1, 0, 0], sizes = [1, 8, 8], strides = [1, 1, 1]} : vector<4x8x8xf32> to vector<1x8x8xf32>
    %62 = vector.shape_cast %61 : vector<1x8x8xf32> to vector<8x8xf32>
    %c0_25 = arith.constant 0 : index
    %c8 = arith.constant 8 : index
    %63 = vector.load %arg19[%c0_25, %c8] : memref<8x32xf32, #tpu.memory_space<vmem>>, vector<8x8xf32>
    tpu.vector_store %arg19[%c0_25, %c8], %62 {strides = array<i32>} : memref<8x32xf32, #tpu.memory_space<vmem>>, vector<8x8xf32>,
    %64 = vector.extract_strided_slice %57 {offsets = [2, 0, 0], sizes = [1, 8, 8], strides = [1, 1, 1]} : vector<4x8x8xf32> to vector<1x8x8xf32>
    %65 = vector.shape_cast %64 : vector<1x8x8xf32> to vector<8x8xf32>
    %c0_26 = arith.constant 0 : index
    %c16 = arith.constant 16 : index
    %66 = vector.load %arg19[%c0_26, %c16] : memref<8x32xf32, #tpu.memory_space<vmem>>, vector<8x8xf32>
    tpu.vector_store %arg19[%c0_26, %c16], %65 {strides = array<i32>} : memref<8x32xf32, #tpu.memory_space<vmem>>, vector<8x8xf32>,
    %67 = vector.extract_strided_slice %57 {offsets = [3, 0, 0], sizes = [1, 8, 8], strides = [1, 1, 1]} : vector<4x8x8xf32> to vector<1x8x8xf32>
    %68 = vector.shape_cast %67 : vector<1x8x8xf32> to vector<8x8xf32>
    %c0_27 = arith.constant 0 : index
    %c24 = arith.constant 24 : index
    %69 = vector.load %arg19[%c0_27, %c24] : memref<8x32xf32, #tpu.memory_space<vmem>>, vector<8x8xf32>
    tpu.vector_store %arg19[%c0_27, %c24], %68 {strides = array<i32>} : memref<8x32xf32, #tpu.memory_space<vmem>>, vector<8x8xf32>,
    %c0_28 = arith.constant 0 : index
    %c0_29 = arith.constant 0 : index
    %70 = vector.load %arg19[%c0_28, %c0_29] : memref<8x32xf32, #tpu.memory_space<vmem>>, vector<8x32xf32>
    %c0_30 = arith.constant 0 : index
    %c0_31 = arith.constant 0 : index
    %c0_32 = arith.constant 0 : index
    %71 = vector.load %arg6[%c0_30, %c0_31, %c0_32] : memref<1x32x32xf32, #tpu.memory_space<vmem>>, vector<1x32x32xf32>
    %72 = vector.shape_cast %71 : vector<1x32x32xf32> to vector<32x32xf32>
    %cst_33 = arith.constant dense<0.000000e+00> : vector<8x32xf32>
    %73 = tpu.matmul %70, %72, %cst_33 {dimension_numbers = #tpu.dot_dimension_numbers<[1], [0], [0], [1], [0, 0, 1, 1], [], []>} : vector<8x32xf32>, vector<32x32xf32>, vector<8x32xf32> -> vector<8x32xf32>
    %c0_34 = arith.constant 0 : index
    %c0_35 = arith.constant 0 : index
    %c0_36 = arith.constant 0 : index
    %74 = vector.load %arg7[%c0_34, %c0_35, %c0_36] : memref<1x1x32xf32, #tpu.memory_space<vmem>>, vector<1x1x32xf32>
    %75 = vector.shape_cast %74 : vector<1x1x32xf32> to vector<1x32xf32>
    %76 = vector.broadcast %75 : vector<1x32xf32> to vector<8x32xf32>
    %77 = arith.addf %73, %76 : vector<8x32xf32>
    %78 = arith.addf %3, %77 : vector<8x32xf32>
    %c0_37 = arith.constant 0 : index
    %c0_38 = arith.constant 0 : index
    %c0_39 = arith.constant 0 : index
    %79 = vector.load %arg8[%c0_37, %c0_38, %c0_39] : memref<1x1x32xf32, #tpu.memory_space<vmem>>, vector<1x1x32xf32>
    %80 = vector.shape_cast %79 : vector<1x1x32xf32> to vector<1x32xf32>
    %c0_40 = arith.constant 0 : index
    %c0_41 = arith.constant 0 : index
    %c0_42 = arith.constant 0 : index
    %81 = vector.load %arg9[%c0_40, %c0_41, %c0_42] : memref<1x1x32xf32, #tpu.memory_space<vmem>>, vector<1x1x32xf32>
    %82 = vector.shape_cast %81 : vector<1x1x32xf32> to vector<1x32xf32>
    %cst_43 = arith.constant dense<0.000000e+00> : vector<8xf32>
    %83 = vector.multi_reduction <add>, %78, %cst_43 [1] : vector<8x32xf32> to vector<8xf32>
    %84 = vector.shape_cast %83 : vector<8xf32> to vector<8x1xf32>
    %cst_44 = arith.constant 3.200000e+01 : f32
    %85 = vector.broadcast %cst_44 : f32 to vector<8x1xf32>
    %86 = arith.divf %84, %85 : vector<8x1xf32>
    %87 = vector.broadcast %86 : vector<8x1xf32> to vector<8x32xf32>
    %88 = arith.subf %78, %87 : vector<8x32xf32>
    %89 = arith.mulf %88, %88 : vector<8x32xf32>
    %cst_45 = arith.constant dense<0.000000e+00> : vector<8xf32>
    %90 = vector.multi_reduction <add>, %89, %cst_45 [1] : vector<8x32xf32> to vector<8xf32>
    %91 = vector.shape_cast %90 : vector<8xf32> to vector<8x1xf32>
    %cst_46 = arith.constant 3.200000e+01 : f32
    %92 = vector.broadcast %cst_46 : f32 to vector<8x1xf32>
    %93 = arith.divf %91, %92 : vector<8x1xf32>
    %cst_47 = arith.constant 9.99999974E-6 : f32
    %94 = vector.broadcast %cst_47 : f32 to vector<8x1xf32>
    %95 = arith.addf %93, %94 : vector<8x1xf32>
    %96 = math.rsqrt %95 : vector<8x1xf32>
    %97 = vector.broadcast %96 : vector<8x1xf32> to vector<8x32xf32>
    %98 = arith.mulf %88, %97 : vector<8x32xf32>
    %99 = vector.broadcast %80 : vector<1x32xf32> to vector<8x32xf32>
    %100 = arith.mulf %99, %98 : vector<8x32xf32>
    %101 = vector.broadcast %82 : vector<1x32xf32> to vector<8x32xf32>
    %102 = arith.addf %100, %101 : vector<8x32xf32>
    %c0_48 = arith.constant 0 : index
    %c0_49 = arith.constant 0 : index
    %c0_50 = arith.constant 0 : index
    %103 = vector.load %arg10[%c0_48, %c0_49, %c0_50] : memref<1x32x128xf32, #tpu.memory_space<vmem>>, vector<1x32x128xf32>
    %104 = vector.shape_cast %103 : vector<1x32x128xf32> to vector<32x128xf32>
    %cst_51 = arith.constant dense<0.000000e+00> : vector<8x128xf32>
    %105 = tpu.matmul %102, %104, %cst_51 {dimension_numbers = #tpu.dot_dimension_numbers<[1], [0], [0], [1], [0, 0, 1, 1], [], []>} : vector<8x32xf32>, vector<32x128xf32>, vector<8x128xf32> -> vector<8x128xf32>
    %c0_52 = arith.constant 0 : index
    %c0_53 = arith.constant 0 : index
    %c0_54 = arith.constant 0 : index
    %106 = vector.load %arg11[%c0_52, %c0_53, %c0_54] : memref<1x1x128xf32, #tpu.memory_space<vmem>>, vector<1x1x128xf32>
    %107 = vector.shape_cast %106 : vector<1x1x128xf32> to vector<1x128xf32>
    %108 = vector.broadcast %107 : vector<1x128xf32> to vector<8x128xf32>
    %109 = arith.addf %105, %108 : vector<8x128xf32>
    %cst_55 = arith.constant 5.000000e-01 : f32
    %110 = vector.broadcast %cst_55 : f32 to vector<8x128xf32>
    %111 = arith.mulf %110, %109 : vector<8x128xf32>
    %cst_56 = arith.constant 4.471500e-02 : f32
    %112 = vector.broadcast %cst_56 : f32 to vector<8x128xf32>
    %113 = arith.mulf %112, %109 : vector<8x128xf32>
    %114 = arith.mulf %113, %109 : vector<8x128xf32>
    %115 = arith.mulf %114, %109 : vector<8x128xf32>
    %116 = arith.addf %109, %115 : vector<8x128xf32>
    %cst_57 = arith.constant 0.797884583 : f32
    %117 = vector.broadcast %cst_57 : f32 to vector<8x128xf32>
    %118 = arith.mulf %117, %116 : vector<8x128xf32>
    %119 = math.tanh %118 : vector<8x128xf32>
    %cst_58 = arith.constant 1.000000e+00 : f32
    %120 = vector.broadcast %cst_58 : f32 to vector<8x128xf32>
    %121 = arith.addf %120, %119 : vector<8x128xf32>
    %122 = arith.mulf %111, %121 : vector<8x128xf32>
    %c0_59 = arith.constant 0 : index
    %c0_60 = arith.constant 0 : index
    %c0_61 = arith.constant 0 : index
    %123 = vector.load %arg12[%c0_59, %c0_60, %c0_61] : memref<1x128x32xf32, #tpu.memory_space<vmem>>, vector<1x128x32xf32>
    %124 = vector.shape_cast %123 : vector<1x128x32xf32> to vector<128x32xf32>
    %cst_62 = arith.constant dense<0.000000e+00> : vector<8x32xf32>
    %125 = tpu.matmul %122, %124, %cst_62 {dimension_numbers = #tpu.dot_dimension_numbers<[1], [0], [0], [1], [0, 0, 1, 1], [], []>} : vector<8x128xf32>, vector<128x32xf32>, vector<8x32xf32> -> vector<8x32xf32>
    %c0_63 = arith.constant 0 : index
    %c0_64 = arith.constant 0 : index
    %c0_65 = arith.constant 0 : index
    %126 = vector.load %arg13[%c0_63, %c0_64, %c0_65] : memref<1x1x32xf32, #tpu.memory_space<vmem>>, vector<1x1x32xf32>
    %127 = vector.shape_cast %126 : vector<1x1x32xf32> to vector<1x32xf32>
    %128 = vector.broadcast %127 : vector<1x32xf32> to vector<8x32xf32>
    %129 = arith.addf %125, %128 : vector<8x32xf32>
    %130 = arith.addf %78, %129 : vector<8x32xf32>
    %c0_66 = arith.constant 0 : index
    %c0_67 = arith.constant 0 : index
    %131 = vector.load %arg18[%c0_66, %c0_67] : memref<8x32xf32, #tpu.memory_space<vmem>>, vector<8x32xf32>
    tpu.vector_store %arg18[%c0_66, %c0_67], %130 {strides = array<i32>} : memref<8x32xf32, #tpu.memory_space<vmem>>, vector<8x32xf32>,
    %c1_i32 = arith.constant 1 : i32
    %132 = arith.cmpi eq, %arg1, %c1_i32 : i32
    %133 = arith.extui %132 : i1 to i32
    %c0_i32_68 = arith.constant 0 : i32
    %134 = arith.cmpi ne, %133, %c0_i32_68 : i32
    scf.if %134 {
      %c0_69 = arith.constant 0 : index
      %c0_70 = arith.constant 0 : index
      %135 = vector.load %arg14[%c0_69, %c0_70] : memref<1x32xf32, #tpu.memory_space<vmem>>, vector<1x32xf32>
      %c0_71 = arith.constant 0 : index
      %c0_72 = arith.constant 0 : index
      %136 = vector.load %arg15[%c0_71, %c0_72] : memref<1x32xf32, #tpu.memory_space<vmem>>, vector<1x32xf32>
      %cst_73 = arith.constant dense<0.000000e+00> : vector<8xf32>
      %137 = vector.multi_reduction <add>, %130, %cst_73 [1] : vector<8x32xf32> to vector<8xf32>
      %138 = vector.shape_cast %137 : vector<8xf32> to vector<8x1xf32>
      %cst_74 = arith.constant 3.200000e+01 : f32
      %139 = vector.broadcast %cst_74 : f32 to vector<8x1xf32>
      %140 = arith.divf %138, %139 : vector<8x1xf32>
      %141 = vector.broadcast %140 : vector<8x1xf32> to vector<8x32xf32>
      %142 = arith.subf %130, %141 : vector<8x32xf32>
      %143 = arith.mulf %142, %142 : vector<8x32xf32>
      %cst_75 = arith.constant dense<0.000000e+00> : vector<8xf32>
      %144 = vector.multi_reduction <add>, %143, %cst_75 [1] : vector<8x32xf32> to vector<8xf32>
      %145 = vector.shape_cast %144 : vector<8xf32> to vector<8x1xf32>
      %cst_76 = arith.constant 3.200000e+01 : f32
      %146 = vector.broadcast %cst_76 : f32 to vector<8x1xf32>
      %147 = arith.divf %145, %146 : vector<8x1xf32>
      %cst_77 = arith.constant 9.99999974E-6 : f32
      %148 = vector.broadcast %cst_77 : f32 to vector<8x1xf32>
      %149 = arith.addf %147, %148 : vector<8x1xf32>
      %150 = math.rsqrt %149 : vector<8x1xf32>
      %151 = vector.broadcast %150 : vector<8x1xf32> to vector<8x32xf32>
      %152 = arith.mulf %142, %151 : vector<8x32xf32>
      %153 = vector.broadcast %135 : vector<1x32xf32> to vector<8x32xf32>
      %154 = arith.mulf %153, %152 : vector<8x32xf32>
      %155 = vector.broadcast %136 : vector<1x32xf32> to vector<8x32xf32>
      %156 = arith.addf %154, %155 : vector<8x32xf32>
      %c0_78 = arith.constant 0 : index
      %c0_79 = arith.constant 0 : index
      %157 = vector.load %arg16[%c0_78, %c0_79] : memref<32x128xf32, #tpu.memory_space<vmem>>, vector<32x128xf32>
      %cst_80 = arith.constant dense<0.000000e+00> : vector<8x128xf32>
      %158 = tpu.matmul %156, %157, %cst_80 {dimension_numbers = #tpu.dot_dimension_numbers<[1], [0], [0], [1], [0, 0, 1, 1], [], []>} : vector<8x32xf32>, vector<32x128xf32>, vector<8x128xf32> -> vector<8x128xf32>
      %c0_81 = arith.constant 0 : index
      %c0_82 = arith.constant 0 : index
      %c0_83 = arith.constant 0 : index
      %159 = vector.load %arg17[%c0_81, %c0_82, %c0_83] : memref<1x8x128xf32, #tpu.memory_space<vmem>>, vector<1x8x128xf32>
      %160 = vector.shape_cast %159 : vector<1x8x128xf32> to vector<8x128xf32>
      %161 = vector.shape_cast %158 : vector<8x128xf32> to vector<1x8x128xf32>
      tpu.vector_store %arg17[%c0_81, %c0_82, %c0_83], %161 {strides = array<i32>} : memref<1x8x128xf32, #tpu.memory_space<vmem>>, vector<1x8x128xf32>,
    } else {
    }
    return
  }
  func.func @transform_0(%arg0: i32, %arg1: i32) -> (i32, i32, i32) {
    %c0_i32 = arith.constant 0 : i32
    %c0_i32_0 = arith.constant 0 : i32
    %c0_i32_1 = arith.constant 0 : i32
    return %arg0, %c0_i32, %c0_i32_0 : i32, i32, i32
  }
  func.func @transform_1(%arg0: i32, %arg1: i32) -> (i32, i32, i32) {
    %c0_i32 = arith.constant 0 : i32
    %c0_i32_0 = arith.constant 0 : i32
    %c0_i32_1 = arith.constant 0 : i32
    return %arg1, %c0_i32, %c0_i32_0 : i32, i32, i32
  }
  func.func @transform_2(%arg0: i32, %arg1: i32) -> (i32, i32, i32) {
    %c0_i32 = arith.constant 0 : i32
    %c0_i32_0 = arith.constant 0 : i32
    %c0_i32_1 = arith.constant 0 : i32
    return %arg1, %c0_i32, %c0_i32_0 : i32, i32, i32
  }
  func.func @transform_3(%arg0: i32, %arg1: i32) -> (i32, i32, i32, i32) {
    %c0_i32 = arith.constant 0 : i32
    %c0_i32_0 = arith.constant 0 : i32
    %c0_i32_1 = arith.constant 0 : i32
    %c0_i32_2 = arith.constant 0 : i32
    return %arg1, %c0_i32, %c0_i32_0, %c0_i32_1 : i32, i32, i32, i32
  }
  func.func @transform_4(%arg0: i32, %arg1: i32) -> (i32, i32, i32) {
    %c0_i32 = arith.constant 0 : i32
    %c0_i32_0 = arith.constant 0 : i32
    %c0_i32_1 = arith.constant 0 : i32
    return %arg1, %c0_i32, %c0_i32_0 : i32, i32, i32
  }
  func.func @transform_5(%arg0: i32, %arg1: i32) -> (i32, i32, i32) {
    %c0_i32 = arith.constant 0 : i32
    %c0_i32_0 = arith.constant 0 : i32
    %c0_i32_1 = arith.constant 0 : i32
    return %arg1, %c0_i32, %c0_i32_0 : i32, i32, i32
  }
  func.func @transform_6(%arg0: i32, %arg1: i32) -> (i32, i32, i32) {
    %c0_i32 = arith.constant 0 : i32
    %c0_i32_0 = arith.constant 0 : i32
    %c0_i32_1 = arith.constant 0 : i32
    return %arg1, %c0_i32, %c0_i32_0 : i32, i32, i32
  }
  func.func @transform_7(%arg0: i32, %arg1: i32) -> (i32, i32, i32) {
    %c0_i32 = arith.constant 0 : i32
    %c0_i32_0 = arith.constant 0 : i32
    %c0_i32_1 = arith.constant 0 : i32
    return %arg1, %c0_i32, %c0_i32_0 : i32, i32, i32
  }
  func.func @transform_8(%arg0: i32, %arg1: i32) -> (i32, i32, i32) {
    %c0_i32 = arith.constant 0 : i32
    %c0_i32_0 = arith.constant 0 : i32
    %c0_i32_1 = arith.constant 0 : i32
    return %arg1, %c0_i32, %c0_i32_0 : i32, i32, i32
  }
  func.func @transform_9(%arg0: i32, %arg1: i32) -> (i32, i32, i32) {
    %c0_i32 = arith.constant 0 : i32
    %c0_i32_0 = arith.constant 0 : i32
    %c0_i32_1 = arith.constant 0 : i32
    return %arg1, %c0_i32, %c0_i32_0 : i32, i32, i32
  }
  func.func @transform_10(%arg0: i32, %arg1: i32) -> (i32, i32, i32) {
    %c0_i32 = arith.constant 0 : i32
    %c0_i32_0 = arith.constant 0 : i32
    %c0_i32_1 = arith.constant 0 : i32
    return %arg1, %c0_i32, %c0_i32_0 : i32, i32, i32
  }
  func.func @transform_11(%arg0: i32, %arg1: i32) -> (i32, i32, i32) {
    %c0_i32 = arith.constant 0 : i32
    %c0_i32_0 = arith.constant 0 : i32
    %c0_i32_1 = arith.constant 0 : i32
    return %arg1, %c0_i32, %c0_i32_0 : i32, i32, i32
  }
  func.func @transform_12(%arg0: i32, %arg1: i32) -> (i32, i32) {
    %c0_i32 = arith.constant 0 : i32
    %c0_i32_0 = arith.constant 0 : i32
    %c0_i32_1 = arith.constant 0 : i32
    return %c0_i32, %c0_i32_0 : i32, i32
  }
  func.func @transform_13(%arg0: i32, %arg1: i32) -> (i32, i32) {
    %c0_i32 = arith.constant 0 : i32
    %c0_i32_0 = arith.constant 0 : i32
    %c0_i32_1 = arith.constant 0 : i32
    return %c0_i32, %c0_i32_0 : i32, i32
  }
  func.func @transform_14(%arg0: i32, %arg1: i32) -> (i32, i32) {
    %c0_i32 = arith.constant 0 : i32
    %c0_i32_0 = arith.constant 0 : i32
    %c0_i32_1 = arith.constant 0 : i32
    return %c0_i32, %c0_i32_0 : i32, i32
  }
  func.func @transform_15(%arg0: i32, %arg1: i32) -> (i32, i32, i32) {
    %c0_i32 = arith.constant 0 : i32
    %c0_i32_0 = arith.constant 0 : i32
    %c0_i32_1 = arith.constant 0 : i32
    return %arg0, %c0_i32, %c0_i32_0 : i32, i32, i32
  }
}

</mosaic_0001>

<bundles_post_ra>
// kernel: tpu_custom_call.1
= control target key start
LH: loop header
LB: loop body
LE: loop exit
PB: predicated region body
PF: predicated region fallthrough
CT: control target
= control target key end

     0   :  { %s4089_s0 = inlined_call_operand.vmem [shape: f32[2,8,32], index: 0, kind: input, shape index: {}]   ;;  %s4090_s1 = inlined_call_operand.vmem [shape: f32[2,1,32], index: 1, kind: input, shape index: {}]   ;;  %s4091_s2 = inlined_call_operand.vmem [shape: f32[2,1,32], index: 2, kind: input, shape index: {}]   ;;  %s4092_s3 = inlined_call_operand.vmem [shape: f32[2,12,32,8], index: 3, kind: input, shape index: {}]   ;;  %s4093_s4 = inlined_call_operand.vmem [shape: f32[2,32,32], index: 4, kind: input, shape index: {}]   ;;  %s4094_s5 = inlined_call_operand.vmem [shape: f32[2,1,32], index: 5, kind: input, shape index: {}]   ;;  %s4095_s6 = inlined_call_operand.vmem [shape: f32[2,1,32], index: 6, kind: input, shape index: {}]   ;;  %s4096_s7 = inlined_call_operand.vmem [shape: f32[2,1,32], index: 7, kind: input, shape index: {}]   ;;  %s4097_s8 = inlined_call_operand.vmem [shape: f32[2,32,128], index: 8, kind: input, shape index: {}]   ;;  %s4098_s9 = inlined_call_operand.vmem [shape: f32[2,1,128], index: 9, kind: input, shape index: {}]   ;;  %s4099_s10 = inlined_call_operand.vmem [shape: f32[2,128,32], index: 10, kind: input, shape index: {}]   ;;  %s4100_s11 = inlined_call_operand.vmem [shape: f32[2,1,32], index: 11, kind: input, shape index: {}]   ;;  %s4101_s12 = inlined_call_operand.vmem [shape: f32[1,32], index: 12, kind: input, shape index: {}]   ;;  %s4102_s13 = inlined_call_operand.vmem [shape: f32[1,32], index: 13, kind: input, shape index: {}]   ;;  %s4103_s14 = inlined_call_operand.vmem [shape: f32[32,128], index: 14, kind: input, shape index: {}]   ;;  %s4104_s15 = inlined_call_operand.hbm [shape: f32[2,8,128], index: 15, kind: output, shape index: {}]  }
   0x1   :  { %4121 = sst [smem:[#allocation20_spill]] %s4089_s0 }
   0x2   :  { %4122 = sst [smem:[#allocation21_spill]] %s4092_s3 }
   0x3   :  { %4123 = sst [smem:[#allocation22_spill]] %s4093_s4 }
   0x4   :  { %4124 = sst [smem:[#allocation23_spill]] %s4101_s12 }
   0x5   :  { %4125 = sst [smem:[#allocation24_spill]] %s4102_s13 }
   0x6   :  { %4126 = sst [smem:[#allocation25_spill]] %s4103_s14 }
   0x7   :  { %4127 = sst [smem:[#allocation26_spill]] %s4104_s15 }
   0x8   :  { %20 = vsyncpa [#allocation5], 0 }
   0x9   :  { %22 = vsyncpa [#allocation5 + $0x1], 0  ;;  %s3577_s18 = smov 0   ;;  %s3579_s19 = smov 0  }
   0xa   :  { %s3581_s20 = smov 0   ;;  %s3583_s21 = smov 0  }
   0xb   :  { %s3585_s22 = smov 0   ;;  %s3587_s23 = smov 0  }
   0xc   :  { %s3589_s24 = smov 0   ;;  %s3591_s25 = smov 0  }
   0xd LB: > { %4128 = sst [smem:[#allocation7_spill]] %s3459_s18  ;;  %s2885_s26 = sadd.s32 4294967295, %s3487_s25   ;;  %s3487_s25 = sphi %s3591_s25, %s28_s25   ;;  %s3483_s24 = sphi %s3589_s24, %s4170_s24   ;;  %s3479_s23 = sphi %s3587_s23, %s4169_s23   ;;  %s3475_s22 = sphi %s3585_s22, %s4168_s22   ;;  %s3471_s21 = sphi %s3583_s21, %s4167_s21   ;;  %s3467_s20 = sphi %s3581_s20, %s4166_s20   ;;  %s3463_s19 = sphi %s3579_s19, %s4165_s19   ;;  %s3459_s18 = sphi %s3577_s18, %s4164_s18  }
   0xe   : > { %4129 = sst [smem:[#allocation8_spill]] %s3463_s19  ;;  %s2886_s27 = sadd.s32 4294967294, %s3487_s25  }
   0xf   : > { %4130 = sst [smem:[#allocation9_spill]] %s3467_s20  ;;  %s37_s28 = sadd.s32 1, %s3479_s23 }
  0x10   : > { %4131 = sst [smem:[#allocation10_spill]] %s3471_s21  ;;  %p38_p0 = scmp.ge.s32.totalorder %s37_s28, 2 }
  0x11   : > { %4132 = sst [smem:[#allocation11_spill]] %s3475_s22  ;;  %s40_s29 = sadd.s32 1, %s3483_s24 }
  0x12   : > { %4133 = sst [smem:[#allocation12_spill]] %s3479_s23  ;;  %p432_p1 = scmp.ne.s32.totalorder %s3467_s20, %s3463_s19 }
  0x13   : > { %4134 = sst [smem:[#allocation13_spill]] %s3483_s24  ;;  %p433_p2 = scmp.eq.s32.totalorder %s2885_s26, 3 }
  0x14   : > { %4135 = sst [smem:[#allocation14_spill]] %s3487_s25  ;;  %s4172_s28 = smov (%p38_p0, %s37_s28), 0 }
  0x15   : > { %4136 = sst [smem:[#allocation15_spill]] %s4172_s28  ;;  %s4174_s29 = smov (!%p38_p0, %s40_s29), %s3483_s24 }
  0x16   : > { %p3626_p3 = por %p433_p2, %p432_p1  ;;  %p438_p4 = scmp.ne.s32.totalorder %s3463_s19, %s3459_s18 }
  0x17   : > { %p42_p5 = scmp.ge.s32.totalorder %s4174_s29, 2  ;;  %p439_p6 = scmp.eq.s32.totalorder %s2886_s27, 3 }
  0x18   : > { %s4137_s30 = scalar_select %p3626_p3, 1, 0 }
  0x19   : > { %p2889_p7 = scmp.ge.s32.totalorder %s3487_s25, 1  ;;  %p547_p8 = scmp.lt.s32.totalorder %s3487_s25, 5 }
  0x1a   : > { %4138 = sst [smem:[#allocation16_spill]] %s4137_s30  ;;  %s4176_s29 = smov (%p42_p5, %s4174_s29), 0 }
  0x1b   : > { %4139 = sst [smem:[#allocation17_spill]] %s4176_s29  ;;  %p3636_p9 = por %p439_p6, %p438_p4 }
  0x1c   : > { %p548_p10 = pnand %p2889_p7, %p547_p8  ;;  %s419_s17 = ssub.s32 %s3483_s24, %s4176_s29 }
  0x1d   : > { %s4140_s16 = scalar_select %p3636_p9, 1, 0 }
  0x1e   : > { %s422_s26 = sadd.s32 1, %s3467_s20  ;;  %p420_p11 = scmp.eq.s32.totalorder %s419_s17, 0 }
  0x1f   : > { %4141 = sst [smem:[#allocation18_spill]] %s4140_s16  ;;  %551 = sbr.rel (%p548_p10) target bundleno = 2892 (0xb4c), region = 80 }
  0x20   : > { %s3644_s28 = scalar_select %p420_p11, %s3467_s20, %s422_s26  }
  0x21   : > { %s4109_s27 = sand.u32 (!%p548_p10), 1, %s3463_s19   ;;  %p635_p12 = scmp.lt.s32.totalorder (!%p548_p10), %s3475_s22, 1 }
  0x22   : > { %4142 = sst [smem:[#allocation19_spill]] %s3644_s28  ;;  %s3650_s23 = sshll.u32 (!%p548_p10), %s4109_s27, 3 }
  0x23   : > { %p639_p13 = scmp.lt.s32.totalorder (!%p548_p10), %s3471_s21, 1  ;;  %s4143_s0 = sld [smem:[#allocation20_spill]] (!%p548_p10) }
  0x24   : > { %s636_s16 = scalar_select %p635_p12, %s3475_s22, 1 }
  0x25   : > { %s3655_s18 = scalar_select %p639_p13, %s3471_s21, 1 }
  0x26   : > { %s2891_s17 = sshll.u32 %s636_s16, 3  ;;  %s4144_s3 = sld [smem:[#allocation21_spill]] }
  0x27   : > { %s3292_s19 = smul.u32 384, %s3655_s18  ;;  %s2941_s22 = sshll.u32 %s3655_s18, 5 }
  0x28   : > { %s4145_s4 = sld [smem:[#allocation22_spill]]  ;;  %s3695_s14 = scalar_lea.vmem %s4097_s8, %s2941_s22 }
  0x29   : > { %s638_s27 = scalar_lea.vmem %s4143_s0, %s2891_s17  ;;  %s663_s0 = scalar_lea.vmem %s4096_s7, %s3655_s18 }
  0x2a   : > { %s671_s16 = scalar_lea.vmem %s4098_s9, %s3655_s18  ;;  %s2943_s17 = sshll.u32 %s3655_s18, 7 }
  0x2b   : > { %s3709_s15 = scalar_lea.vmem %s4099_s10, %s2943_s17  ;;  %s634_s30 = scalar_lea.vmem [#allocation4], %s3650_s23 }
  0x2c   : > { %s3677_s29 = scalar_lea.vmem %s4144_s3, %s3292_s19  ;;  %s4146_s25 = sld [smem:[#allocation10_spill]] }
  0x2e   : > { %s3682_s24 = scalar_lea.vmem %s4145_s4, %s2941_s22  ;;  %s679_s4 = scalar_lea.vmem %s4100_s11, %s3655_s18 }
  0x32   : > { %p2899_p0 = scmp.ne.s32.totalorder %s4146_s25, 0 }
  0x34   : > { %683 = sbr.rel (%p2899_p0) target bundleno = 59 (0x3b), region = 84 }
  0x39   : > { %v684_v0 = vld [vmem:[%s638_s27] sm:$0xff]  ;;  %vm685_vm0 = vcmask 261120  }
  0x3a   : > { %686 = vst.msk [vmem:[#allocation2] sm:$0xff] %vm685_vm0, %v684_v0 }
  0x3b PF: > { %vm696_vm1 = vcmask 261120   ;;  %v3489_v8 = vmov 0.0   ;;  %v728_v9 = vld [vmem:[%s3677_s29 + $0x18] sm:$0xff]  ;;  %v727_v11 = vld [vmem:[%s3677_s29 + $0x10] sm:$0xff]  ;;  %v726_v13 = vld [vmem:[%s3677_s29 + $0x8] sm:$0xff]  ;;  %vm3490_vm2 = vmmov 0   ;;  %s4147_s27 = scalar_lea.vmem %s4090_s1, %s3655_s18  ;;  %s4148_s19 = scalar_lea.vmem %s4091_s2, %s3655_s18 }
  0x3c   : > { %3052 = vmatprep.subr.mxu1 %v3489_v8  ;;  %3096 = vmatprep.subr.mxu0 %v3489_v8  ;;  %v744_v10 = vld [vmem:[%s3677_s29 + $0x98] sm:$0xff]  ;;  %v743_v12 = vld [vmem:[%s3677_s29 + $0x90] sm:$0xff]  ;;  %v742_v14 = vld [vmem:[%s3677_s29 + $0x88] sm:$0xff]  ;;  %vm1616_vm3 = vcmask 64512   ;;  %s3492_s21 = smov 8   ;;  %s3493_s17 = smov 24  }
  0x3d   : > { %3053 = vmatpush3.msra.mxu1 %v728_v9  ;;  %3097 = vmatpush3.msra.mxu0 %v744_v10  ;;  %v725_v15 = vld [vmem:[%s3677_s29] sm:$0xff]  ;;  %v732_v26 = vld [vmem:[%s3677_s29 + $0x38] sm:$0xff]  ;;  %v731_v28 = vld [vmem:[%s3677_s29 + $0x30] sm:$0xff]  ;;  %vm2262_vm5 = vcmask 130112   ;;  %vm2268_vm6 = vcmask 195712   ;;  %vm2274_vm7 = vcmask 261312   ;;  %s4149_s20 = scalar_lea.vmem %s4094_s5, %s3655_s18  ;;  %s4150_s3 = scalar_lea.vmem %s4095_s6, %s3655_s18 }
  0x3e   : > { %3054 = vmatprep.subr.mxu1 %v3489_v8  ;;  %3098 = vmatprep.subr.mxu0 %v3489_v8  ;;  %v741_v16 = vld [vmem:[%s3677_s29 + $0x80] sm:$0xff]  ;;  %v752_v27 = vld [vmem:[%s3677_s29 + $0xd8] sm:$0xff]  ;;  %v751_v29 = vld [vmem:[%s3677_s29 + $0xd0] sm:$0xff] }
  0x3f   : > { %3055 = vmatpush3.msra.mxu1 %v727_v11  ;;  %3099 = vmatpush3.msra.mxu0 %v743_v12  ;;  %v2900_v21 = vld [vmem:[%s4147_s27] ss:$0 sm:$0xff]  ;;  %v730_v30 = vld [vmem:[%s3677_s29 + $0x28] sm:$0xff]  ;;  %v736_v34 = vld [vmem:[%s3677_s29 + $0x58] sm:$0xff] }
  0x40   : > { %3056 = vmatprep.subr.mxu1 %v3489_v8  ;;  %3100 = vmatprep.subr.mxu0 %v3489_v8  ;;  %v2901_v23 = vld [vmem:[%s4148_s19] ss:$0 sm:$0xff]  ;;  %v750_v31 = vld [vmem:[%s3677_s29 + $0xc8] sm:$0xff]  ;;  %v760_v35 = vld [vmem:[%s3677_s29 + $0x118] sm:$0xff] }
  0x41   : > { %v3713_v1 = vld [vmem:[#allocation2] sm:$0xff]  ;;  %3057 = vmatpush3.msra.mxu1 %v726_v13  ;;  %3101 = vmatpush3.msra.mxu0 %v742_v14  ;;  %v735_v36 = vld [vmem:[%s3677_s29 + $0x50] sm:$0xff]  ;;  %v734_v38 = vld [vmem:[%s3677_s29 + $0x48] sm:$0xff] }
  0x42   : > { %v697_v2 = vsel %vm696_vm1, %v3713_v1, 0.0  ;;  %3058 = vmatprep.subr.mxu1 %v3489_v8  ;;  %3102 = vmatprep.subr.mxu0 %v3489_v8  ;;  %v729_v32 = vld [vmem:[%s3677_s29 + $0x20] sm:$0xff]  ;;  %v759_v37 = vld [vmem:[%s3677_s29 + $0x110] sm:$0xff]  ;;  %v758_v39 = vld [vmem:[%s3677_s29 + $0x108] sm:$0xff] }
  0x43   : > { %698 = vadd.xlane.f32.xlu0 %v697_v2  ;;  %3059 = vmatpush3.msra.mxu1 %v725_v15  ;;  %v749_v33 = vld [vmem:[%s3677_s29 + $0xc0] sm:$0xff]  ;;  %v740_v42 = vld [vmem:[%s3677_s29 + $0x78] sm:$0xff]  ;;  %v739_v44 = vld [vmem:[%s3677_s29 + $0x70] sm:$0xff] }
  0x44   : > { %3103 = vmatpush3.msra.mxu0 %v741_v16  ;;  %3060 = vmatprep.mubr.msk.f32.mxu1 %vm3490_vm2, %v3489_v8  ;;  %v733_v40 = vld [vmem:[%s3677_s29 + $0x40] sm:$0xff]  ;;  %v768_v43 = vld [vmem:[%s3677_s29 + $0x158] sm:$0xff]  ;;  %v767_v45 = vld [vmem:[%s3677_s29 + $0x150] sm:$0xff] }
  0x45   : > { %3063 = vmatprep.subr.mxu1 %v3489_v8  ;;  %3104 = vmatprep.mubr.msk.f32.mxu0 %vm3490_vm2, %v3489_v8  ;;  %v757_v41 = vld [vmem:[%s3677_s29 + $0x100] sm:$0xff]  ;;  %v738_v46 = vld [vmem:[%s3677_s29 + $0x68] sm:$0xff]  ;;  %v748_v50 = vld [vmem:[%s3677_s29 + $0xb8] sm:$0xff] }
  0x46   : > { %3118 = vmatprep.subr.mxu0 %v3489_v8  ;;  %v766_v47 = vld [vmem:[%s3677_s29 + $0x148] sm:$0xff]  ;;  %v737_v48 = vld [vmem:[%s3677_s29 + $0x60] sm:$0xff]  ;;  %v747_v51 = vld [vmem:[%s3677_s29 + $0xb0] sm:$0xff] }
  0x47   : > { %v765_v49 = vld [vmem:[%s3677_s29 + $0x140] sm:$0xff]  ;;  %v746_v52 = vld [vmem:[%s3677_s29 + $0xa8] sm:$0xff]  ;;  %v756_v54 = vld [vmem:[%s3677_s29 + $0xf8] sm:$0xff] }
  0x48   : > { %v745_v53 = vld [vmem:[%s3677_s29 + $0xa0] sm:$0xff]  ;;  %v755_v55 = vld [vmem:[%s3677_s29 + $0xf0] sm:$0xff]  ;;  %v754_v56 = vld [vmem:[%s3677_s29 + $0xe8] sm:$0xff] }
  0x49   : > { %v753_v57 = vld [vmem:[%s3677_s29 + $0xe0] sm:$0xff]  ;;  %v764_v58 = vld [vmem:[%s3677_s29 + $0x138] sm:$0xff]  ;;  %v763_v59 = vld [vmem:[%s3677_s29 + $0x130] sm:$0xff] }
  0x4a   : > { %v762_v60 = vld [vmem:[%s3677_s29 + $0x128] sm:$0xff]  ;;  %v761_v61 = vld [vmem:[%s3677_s29 + $0x120] sm:$0xff]  ;;  %v772_v62 = vld [vmem:[%s3677_s29 + $0x178] sm:$0xff] }
  0x4b   : > { %v771_v63 = vld [vmem:[%s3677_s29 + $0x170] sm:$0xff]  ;;  %v770_v0 = vld [vmem:[%s3677_s29 + $0x168] sm:$0xff]  ;;  %v769_v2 = vld [vmem:[%s3677_s29 + $0x160] sm:$0xff]  ;;  %s3491_s29 = smov 16  }
  0xcc   : > { %v699_v3 = vpop.xlane.xlu0 %698 }
  0xcd   : > { %v701_v4 = vmul.f32 0.03125, %v699_v3 }
  0xcf   : > { %v702_v5 = vsub.f32 %v3713_v1, %v701_v4 }
  0xd1   : > { %v703_v6 = vmul.f32 %v702_v5, %v702_v5 }
  0xd3   : > { %v704_v7 = vsel %vm696_vm1, %v703_v6, 0.0 }
  0xd4   : > { %705 = vadd.xlane.f32.xlu0 %v704_v7 }
 0x15d   : > { %v706_v17 = vpop.xlane.xlu0 %705 }
 0x15e   : > { %v707_v18 = vmul.f32 0.03125, %v706_v17 }
 0x160   : > { %v708_v19 = vadd.f32 1e-05, %v707_v18 }
 0x162   : > { %3371 = vrsqrt.f32 %v708_v19 }
 0x16f   : > { %v3372_v20 = vpop.eup %3371 }
 0x170   : > { %v710_v22 = vmul.f32 %v3372_v20, %v702_v5 }
 0x172   : > { %v717_v24 = vmul.f32 %v2900_v21, %v710_v22 }
 0x174   : > { %v3751_v25 = vadd.f32 %v2901_v23, %v717_v24 }
 0x176   : > { %3061 = vmatmul.mubr.msk.f32.vlgmr.msra.gmra.mxu1 %vm696_vm1, %v3751_v25  ;;  %3105 = vmatmul.mubr.msk.f32.vlgmr.msra.gmra.mxu0 %vm696_vm1, %v3751_v25 }
 0x177   : > { %3064 = vmatpush3.msra.mxu1 %v732_v26  ;;  %3119 = vmatpush3.msra.mxu0 %v752_v27 }
 0x178   : > { %3065 = vmatprep.subr.mxu1 %v3489_v8  ;;  %3120 = vmatprep.subr.mxu0 %v3489_v8 }
 0x179   : > { %3066 = vmatpush3.msra.mxu1 %v731_v28  ;;  %3121 = vmatpush3.msra.mxu0 %v751_v29  ;;  %v688_v28 = vlaneseq }
 0x17a   : > { %3067 = vmatprep.subr.mxu1 %v3489_v8  ;;  %3122 = vmatprep.subr.mxu0 %v3489_v8 }
 0x17b   : > { %3068 = vmatpush3.msra.mxu1 %v730_v30  ;;  %3123 = vmatpush3.msra.mxu0 %v750_v31  ;;  %v689_v29 = vshrl.u32 %v688_v28, 7  ;;  %v691_v30 = vand.u32 127, %v688_v28 }
 0x17c   : > { %3069 = vmatprep.subr.mxu1 %v3489_v8  ;;  %3124 = vmatprep.subr.mxu0 %v3489_v8 }
 0x17d   : > { %3070 = vmatpush3.msra.mxu1 %v729_v32  ;;  %3071 = vmatprep.mubr.msk.f32.mxu1 %vm3490_vm2, %v3489_v8  ;;  %vm692_vm4 = vcmp.gt.s32.totalorder %v691_v30, %v689_v29 }
 0x17e   : > { %3125 = vmatpush3.msra.mxu0 %v749_v33  ;;  %3126 = vmatprep.mubr.msk.f32.mxu0 %vm3490_vm2, %v3489_v8  ;;  %v693_v31 = vsel %vm692_vm4, -1e+30, %v3489_v8 }
 0x17f   : > { %3072 = vmatmul.mubr.msk.f32.vlgmr.msra.gmra.mxu1 %vm696_vm1, %v3751_v25  ;;  %3074 = vmatprep.subr.mxu1 %v3489_v8 }
 0x180   : > { %3127 = vmatmul.mubr.msk.f32.vlgmr.msra.gmra.mxu0 %vm696_vm1, %v3751_v25  ;;  %3140 = vmatprep.subr.mxu0 %v3489_v8 }
 0x181   : > { %3075 = vmatpush3.msra.mxu1 %v736_v34  ;;  %3141 = vmatpush3.msra.mxu0 %v760_v35 }
 0x182   : > { %3076 = vmatprep.subr.mxu1 %v3489_v8  ;;  %3142 = vmatprep.subr.mxu0 %v3489_v8 }
 0x183   : > { %3077 = vmatpush3.msra.mxu1 %v735_v36  ;;  %3143 = vmatpush3.msra.mxu0 %v759_v37 }
 0x184   : > { %3078 = vmatprep.subr.mxu1 %v3489_v8  ;;  %3144 = vmatprep.subr.mxu0 %v3489_v8 }
 0x185   : > { %3079 = vmatpush3.msra.mxu1 %v734_v38  ;;  %3145 = vmatpush3.msra.mxu0 %v758_v39 }
 0x186   : > { %3080 = vmatprep.subr.mxu1 %v3489_v8  ;;  %3146 = vmatprep.subr.mxu0 %v3489_v8 }
 0x187   : > { %3081 = vmatpush3.msra.mxu1 %v733_v40  ;;  %3082 = vmatprep.mubr.msk.f32.mxu1 %vm3490_vm2, %v3489_v8 }
 0x188   : > { %3147 = vmatpush3.msra.mxu0 %v757_v41  ;;  %3148 = vmatprep.mubr.msk.f32.mxu0 %vm3490_vm2, %v3489_v8 }
 0x189   : > { %3083 = vmatmul.mubr.msk.f32.vlgmr.msra.gmra.mxu1 %vm696_vm1, %v3751_v25  ;;  %3085 = vmatprep.subr.mxu1 %v3489_v8 }
 0x18a   : > { %3149 = vmatmul.mubr.msk.f32.vlgmr.msra.gmra.mxu0 %vm696_vm1, %v3751_v25  ;;  %3162 = vmatprep.subr.mxu0 %v3489_v8 }
 0x18b   : > { %3086 = vmatpush3.msra.mxu1 %v740_v42  ;;  %3163 = vmatpush3.msra.mxu0 %v768_v43 }
 0x18c   : > { %3087 = vmatprep.subr.mxu1 %v3489_v8  ;;  %3164 = vmatprep.subr.mxu0 %v3489_v8 }
 0x18d   : > { %3088 = vmatpush3.msra.mxu1 %v739_v44  ;;  %3165 = vmatpush3.msra.mxu0 %v767_v45 }
 0x18e   : > { %3089 = vmatprep.subr.mxu1 %v3489_v8  ;;  %3166 = vmatprep.subr.mxu0 %v3489_v8 }
 0x18f   : > { %3090 = vmatpush3.msra.mxu1 %v738_v46  ;;  %3167 = vmatpush3.msra.mxu0 %v766_v47 }
 0x190   : > { %3091 = vmatprep.subr.mxu1 %v3489_v8  ;;  %3168 = vmatprep.subr.mxu0 %v3489_v8 }
 0x191   : > { %3092 = vmatpush3.msra.mxu1 %v737_v48  ;;  %3093 = vmatprep.mubr.msk.f32.mxu1 %vm3490_vm2, %v3489_v8 }
 0x192   : > { %3169 = vmatpush3.msra.mxu0 %v765_v49  ;;  %3170 = vmatprep.mubr.msk.f32.mxu0 %vm3490_vm2, %v3489_v8 }
 0x193   : > { %3094 = vmatmul.mubr.msk.f32.vlgmr.msra.gmra.mxu1 %vm696_vm1, %v3751_v25  ;;  %3107 = vmatprep.subr.mxu1 %v3489_v8 }
 0x194   : > { %3171 = vmatmul.mubr.msk.f32.vlgmr.msra.gmra.mxu0 %vm696_vm1, %v3751_v25  ;;  %3108 = vmatpush3.msra.mxu1 %v748_v50 }
 0x195   : > { %3109 = vmatprep.subr.mxu1 %v3489_v8  ;;  %3115 = vmatprep.mubr.msk.f32.mxu1 %vm3490_vm2, %v3489_v8 }
 0x196   : > { %3110 = vmatpush3.msra.mxu1 %v747_v51  ;;  %3184 = vmatprep.subr.mxu0 %v3489_v8 }
 0x197   : > { %3111 = vmatprep.subr.mxu1 %v3489_v8  ;;  %3186 = vmatprep.mubr.msk.f32.mxu0 %vm3490_vm2, %v3489_v8 }
 0x198   : > { %3112 = vmatpush3.msra.mxu1 %v746_v52 }
 0x199   : > { %3113 = vmatprep.subr.mxu1 %v3489_v8 }
 0x19a   : > { %3114 = vmatpush3.msra.mxu1 %v745_v53 }
 0x19b   : > { %3116 = vmatmul.mubr.msk.f32.vlgmr.msra.gmra.mxu1 %vm696_vm1, %v3751_v25  ;;  %3129 = vmatprep.subr.mxu1 %v3489_v8 }
 0x19c   : > { %3130 = vmatpush3.msra.mxu1 %v756_v54  ;;  %3137 = vmatprep.mubr.msk.f32.mxu1 %vm3490_vm2, %v3489_v8 }
 0x19d   : > { %3131 = vmatprep.subr.mxu1 %v3489_v8 }
 0x19e   : > { %3132 = vmatpush3.msra.mxu1 %v755_v55 }
 0x19f   : > { %3133 = vmatprep.subr.mxu1 %v3489_v8 }
 0x1a0   : > { %3134 = vmatpush3.msra.mxu1 %v754_v56 }
 0x1a1   : > { %3135 = vmatprep.subr.mxu1 %v3489_v8 }
 0x1a2   : > { %3136 = vmatpush3.msra.mxu1 %v753_v57 }
 0x1a3   : > { %3138 = vmatmul.mubr.msk.f32.vlgmr.msra.gmra.mxu1 %vm696_vm1, %v3751_v25  ;;  %3151 = vmatprep.subr.mxu1 %v3489_v8 }
 0x1a4   : > { %3152 = vmatpush3.msra.mxu1 %v764_v58  ;;  %3159 = vmatprep.mubr.msk.f32.mxu1 %vm3490_vm2, %v3489_v8 }
 0x1a5   : > { %3153 = vmatprep.subr.mxu1 %v3489_v8 }
 0x1a6   : > { %3154 = vmatpush3.msra.mxu1 %v763_v59 }
 0x1a7   : > { %3155 = vmatprep.subr.mxu1 %v3489_v8 }
 0x1a8   : > { %3156 = vmatpush3.msra.mxu1 %v762_v60 }
 0x1a9   : > { %3157 = vmatprep.subr.mxu1 %v3489_v8 }
 0x1aa   : > { %3158 = vmatpush3.msra.mxu1 %v761_v61 }
 0x1ab   : > { %3160 = vmatmul.mubr.msk.f32.vlgmr.msra.gmra.mxu1 %vm696_vm1, %v3751_v25  ;;  %3173 = vmatprep.subr.mxu1 %v3489_v8 }
 0x1ac   : > { %3174 = vmatpush3.msra.mxu1 %v772_v62  ;;  %3181 = vmatprep.mubr.msk.f32.mxu1 %vm3490_vm2, %v3489_v8 }
 0x1ad   : > { %3175 = vmatprep.subr.mxu1 %v3489_v8 }
 0x1ae   : > { %3176 = vmatpush3.msra.mxu1 %v771_v63 }
 0x1af   : > { %3177 = vmatprep.subr.mxu1 %v3489_v8 }
 0x1b0   : > { %3178 = vmatpush3.msra.mxu1 %v770_v0 }
 0x1b1   : > { %3179 = vmatprep.subr.mxu1 %v3489_v8 }
 0x1b2   : > { %3180 = vmatpush3.msra.mxu1 %v769_v2 }
 0x1b3   : > { %3182 = vmatmul.mubr.msk.f32.vlgmr.msra.gmra.mxu1 %vm696_vm1, %v3751_v25  ;;  %3189 = vmatprep.subr.mxu1 %v3489_v8 }
 0x1b4   : > { %3191 = vmatprep.mubr.msk.f32.mxu1 %vm3490_vm2, %v3489_v8 }
 0x236   : > { %v842_v3 = vpop.f32.mrf.mxu1  ;;  %v1122_v4 = vpop.f32.mrf.mxu0 }
 0x237   : > { %3185 = vmatpush3.xpose.msk.msra.mxu0 %vm1616_vm3, %v1122_v4 }
 0x238   : > { %v3062_v5 = vpop.f32.mrf.mxu1  ;;  %v3106_v6 = vpop.f32.mrf.mxu0  ;;  %3194 = vmatprep.subr.mxu0 %v3489_v8 }
 0x23a   : > { %3187 = vmatmul.mubr.msk.f32.vlgmr.msra.gmra.mxu0 %vm1616_vm3, %v842_v3 }
 0x23b   : > { %3196 = vmatprep.mubr.msk.f32.mxu0 %vm3490_vm2, %v3489_v8 }
 0x23f   : > { %v912_v7 = vpop.f32.mrf.mxu1 }
 0x240   : > { %v1262_v9 = vpop.f32.mrf.mxu0 }
 0x241   : > { %3195 = vmatpush3.xpose.msk.msra.mxu0 %vm1616_vm3, %v1262_v9  ;;  %v3073_v10 = vpop.f32.mrf.mxu1 }
 0x242   : > { %v3128_v11 = vpop.f32.mrf.mxu0  ;;  %3204 = vmatprep.subr.mxu0 %v3489_v8 }
 0x249   : > { %v982_v12 = vpop.f32.mrf.mxu1 }
 0x24a   : > { %v1402_v13 = vpop.f32.mrf.mxu0  ;;  %3197 = vmatmul.mubr.msk.f32.vlgmr.msra.gmra.mxu0 %vm1616_vm3, %v982_v12 }
 0x24b   : > { %3205 = vmatpush3.msra.mxu0 %v1402_v13  ;;  %v3084_v14 = vpop.f32.mrf.mxu1  ;;  %3206 = vmatprep.mubr.msk.f32.mxu0 %vm3490_vm2, %v3489_v8 }
 0x24c   : > { %v3150_v15 = vpop.f32.mrf.mxu0  ;;  %3214 = vmatprep.subr.mxu0 %v3489_v8 }
 0x253   : > { %v1052_v16 = vpop.f32.mrf.mxu1 }
 0x254   : > { %v3892_v17 = vpop.f32.mrf.mxu0 }
 0x255   : > { %v3095_v18 = vpop.f32.mrf.mxu1 }
 0x256   : > { %v3172_v19 = vpop.f32.mrf.mxu0 }
 0x25b   : > { %v1192_v20 = vpop.f32.mrf.mxu1 }
 0x25c   : > { %3190 = vmatpush3.xpose.msk.msra.mxu1 %vm1616_vm3, %v1192_v20 }
 0x25d   : > { %v3117_v21 = vpop.f32.mrf.mxu1  ;;  %3199 = vmatprep.subr.mxu1 %v3489_v8 }
 0x25f   : > { %3192 = vmatmul.mubr.msk.f32.vlgmr.msra.gmra.mxu1 %vm1616_vm3, %v912_v7 }
 0x260   : > { %3201 = vmatprep.mubr.msk.f32.mxu1 %vm3490_vm2, %v3489_v8 }
 0x263   : > { %v1332_v22 = vpop.f32.mrf.mxu1 }
 0x264   : > { %3200 = vmatpush3.xpose.msk.msra.mxu1 %vm1616_vm3, %v1332_v22  ;;  %v2280_v22 = vld [vmem:[%s3682_s24 + $0x18] sm:$0xff] }
 0x265   : > { %v3139_v23 = vpop.f32.mrf.mxu1  ;;  %3209 = vmatprep.subr.mxu1 %v3489_v8 }
 0x266   : > { %v2279_v23 = vld [vmem:[%s3682_s24 + $0x10] sm:$0xff] }
 0x267   : > { %3202 = vmatmul.mubr.msk.f32.vlgmr.msra.gmra.mxu1 %vm1616_vm3, %v1052_v16 }
 0x268   : > { %3211 = vmatprep.mubr.msk.f32.mxu1 %vm3490_vm2, %v3489_v8 }
 0x26b   : > { %v1472_v24 = vpop.f32.mrf.mxu1 }
 0x26c   : > { %3210 = vmatpush3.msra.mxu1 %v1472_v24  ;;  %v2278_v24 = vld [vmem:[%s3682_s24 + $0x8] sm:$0xff] }
 0x26d   : > { %v3161_v25 = vpop.f32.mrf.mxu1  ;;  %3219 = vmatprep.subr.mxu1 %v3489_v8 }
 0x273   : > { %v3905_v26 = vpop.f32.mrf.mxu1 }
 0x275   : > { %v3183_v27 = vpop.f32.mrf.mxu1 }
 0x2fa   : > { %v1689_v32 = vpop.f32.mrf.mxu0 }
 0x2fb   : > { %v1690_v33 = vadd.f32 %v1689_v32, %v693_v31 }
 0x2fc   : > { %v3188_v34 = vpop.f32.mrf.mxu0 }
 0x2fd   : > { %v1921_v35 = vsel %vm1616_vm3, %v1690_v33, -inf  ;;  %v2926_v34 = vld [vmem:[%s4149_s20] ss:$0 sm:$0xff] }
 0x2fe   : > { %1922 = vmax.xlane.f32.xlu1 %v1921_v35 }
 0x30a   : > { %v1841_v36 = vpop.f32.mrf.mxu0 }
 0x30b   : > { %v1842_v37 = vadd.f32 %v1841_v36, %v693_v31 }
 0x30c   : > { %v3198_v38 = vpop.f32.mrf.mxu0 }
 0x30d   : > { %v1927_v39 = vsel %vm1616_vm3, %v1842_v37, -inf }
 0x30e   : > { %1928 = vmax.xlane.f32.xlu0 %v1927_v39 }
 0x31f   : > { %v1765_v40 = vpop.f32.mrf.mxu1 }
 0x320   : > { %v1766_v41 = vadd.f32 %v1765_v40, %v693_v31 }
 0x321   : > { %v3193_v42 = vpop.f32.mrf.mxu1 }
 0x322   : > { %v1924_v43 = vsel %vm1616_vm3, %v1766_v41, -inf }
 0x323   : > { %1925 = vmax.xlane.f32.xlu1 %v1924_v43 }
 0x327   : > { %v1917_v44 = vpop.f32.mrf.mxu1 }
 0x328   : > { %v1918_v45 = vadd.f32 %v1917_v44, %v693_v31 }
 0x329   : > { %v3203_v46 = vpop.f32.mrf.mxu1 }
 0x32a   : > { %v1930_v47 = vsel %vm1616_vm3, %v1918_v45, -inf  ;;  %v2393_v46 = vld [vmem:[%s3695_s14 + $0x10] sm:$0xff] }
 0x32b   : > { %1931 = vmax.xlane.f32.xlu1 %v1930_v47  ;;  %v2391_v47 = vld [vmem:[%s3695_s14] sm:$0xff] }
 0x387   : > { %v1923_v48 = vpop.xlane.xlu1 %1922 }
 0x388   : > { %v1933_v49 = vsub.f32 %v1690_v33, %v1923_v48 }
 0x38a   : > { %v1937_v50 = vmul.f32 1.442695, %v1933_v49 }
 0x38c   : > { %3373 = vpow2.f32 %v1937_v50 }
 0x397   : > { %v1929_v51 = vpop.xlane.xlu0 %1928 }
 0x398   : > { %v1935_v52 = vsub.f32 %v1842_v37, %v1929_v51 }
 0x399   : > { %v3374_v53 = vpop.eup %3373 }
 0x39a   : > { %v1941_v54 = vmul.f32 1.442695, %v1935_v52  ;;  %v1945_v55 = vsel %vm1616_vm3, %v3374_v53, 0.0  ;;  %v2928_v52 = vld [vmem:[%s4150_s3] ss:$0 sm:$0xff] }
 0x39b   : > { %1946 = vadd.xlane.f32.xlu0 %v1945_v55 }
 0x39c   : > { %3375 = vpow2.f32 %v1941_v54  ;;  %v2929_v54 = vld [vmem:[%s663_s0] ss:$0 sm:$0xff] }
 0x3a9   : > { %v3376_v56 = vpop.eup %3375 }
 0x3aa   : > { %v1951_v57 = vsel %vm1616_vm3, %v3376_v56, 0.0 }
 0x3ab   : > { %1952 = vadd.xlane.f32.xlu0 %v1951_v57  ;;  %v2499_v57 = vld [vmem:[%s3709_s15 + $0x78] sm:$0xff] }
 0x3ac   : > { %v1926_v58 = vpop.xlane.xlu1 %1925 }
 0x3ad   : > { %v1934_v59 = vsub.f32 %v1766_v41, %v1926_v58  ;;  %v2498_v58 = vld [vmem:[%s3709_s15 + $0x70] sm:$0xff] }
 0x3af   : > { %v1939_v60 = vmul.f32 1.442695, %v1934_v59  ;;  %v2497_v59 = vld [vmem:[%s3709_s15 + $0x68] sm:$0xff] }
 0x3b1   : > { %3377 = vpow2.f32 %v1939_v60  ;;  %v2496_v60 = vld [vmem:[%s3709_s15 + $0x60] sm:$0xff] }
 0x3b4   : > { %v1932_v61 = vpop.xlane.xlu1 %1931 }
 0x3b5   : > { %v1936_v62 = vsub.f32 %v1918_v45, %v1932_v61  ;;  %v2394_v45 = vld [vmem:[%s3695_s14 + $0x18] sm:$0xff] }
 0x3b6   : > { %v2495_v61 = vld [vmem:[%s3709_s15 + $0x58] sm:$0xff] }
 0x3b7   : > { %v1943_v63 = vmul.f32 1.442695, %v1936_v62  ;;  %v2494_v62 = vld [vmem:[%s3709_s15 + $0x50] sm:$0xff] }
 0x3b9   : > { %3379 = vpow2.f32 %v1943_v63  ;;  %v2493_v63 = vld [vmem:[%s3709_s15 + $0x48] sm:$0xff] }
 0x3be   : > { %v3378_v0 = vpop.eup %3377 }
 0x3bf   : > { %v1948_v2 = vsel %vm1616_vm3, %v3378_v0, 0.0 }
 0x3c0   : > { %1949 = vadd.xlane.f32.xlu1 %v1948_v2  ;;  %v2491_v2 = vld [vmem:[%s3709_s15 + $0x38] sm:$0xff] }
 0x3c6   : > { %v3380_v3 = vpop.eup %3379 }
 0x3c7   : > { %v1954_v4 = vsel %vm1616_vm3, %v3380_v3, 0.0 }
 0x3c8   : > { %1955 = vadd.xlane.f32.xlu1 %v1954_v4  ;;  %v2489_v4 = vld [vmem:[%s3709_s15 + $0x28] sm:$0xff] }
 0x424   : > { %v1947_v5 = vpop.xlane.xlu0 %1946 }
 0x425   : > { %3381 = vrcp.f32 %v1947_v5  ;;  %v2488_v5 = vld [vmem:[%s3709_s15 + $0x20] sm:$0xff] }
 0x432   : > { %v3382_v6 = vpop.eup %3381 }
 0x433   : > { %v1961_v7 = vmul.f32 %v3382_v6, %v3374_v53  ;;  %v2487_v6 = vld [vmem:[%s3709_s15 + $0x18] sm:$0xff] }
 0x434   : > { %v1953_v9 = vpop.xlane.xlu0 %1952 }
 0x435   : > { %3383 = vrcp.f32 %v1953_v9  ;;  %3207 = vmatmul.mubr.msk.f32.vlgmr.msra.gmra.mxu0 %vm1616_vm3, %v1961_v7  ;;  %v2486_v7 = vld [vmem:[%s3709_s15 + $0x10] sm:$0xff]  ;;  %v2485_v9 = vld [vmem:[%s3709_s15 + $0x8] sm:$0xff] }
 0x436   : > { %3215 = vmatpush3.msra.mxu0 %v3892_v17  ;;  %3216 = vmatprep.mubr.msk.f32.mxu0 %vm3490_vm2, %v3489_v8 }
 0x437   : > { %3224 = vmatprep.subr.mxu0 %v3489_v8 }
 0x442   : > { %v3384_v10 = vpop.eup %3383 }
 0x443   : > { %v1963_v11 = vmul.f32 %v3384_v10, %v3376_v56  ;;  %v2484_v10 = vld [vmem:[%s3709_s15] sm:$0xff] }
 0x445   : > { %3217 = vmatmul.mubr.msk.f32.vlgmr.msra.gmra.mxu0 %vm1616_vm3, %v1963_v11  ;;  %v2930_v11 = vld [vmem:[%s671_s16] ss:$0 sm:$0xff]  ;;  %s4151_s16 = sld [smem:[#allocation10_spill]] }
 0x446   : > { %3232 = vmatprep.mubr.msk.f32.mxu0 %vm3490_vm2, %v3489_v8  ;;  %3225 = vmatpush3.msra.mxu0 %v2280_v22 }
 0x447   : > { %3226 = vmatprep.subr.mxu0 %v3489_v8 }
 0x448   : > { %3227 = vmatpush3.msra.mxu0 %v2279_v23  ;;  %v2932_v23 = vld [vmem:[%s679_s4] ss:$0 sm:$0xff] }
 0x449   : > { %v1950_v12 = vpop.xlane.xlu1 %1949  ;;  %3228 = vmatprep.subr.mxu0 %v3489_v8 }
 0x44a   : > { %3385 = vrcp.f32 %v1950_v12  ;;  %3229 = vmatpush3.msra.mxu0 %v2278_v24 }
 0x44b   : > { %3230 = vmatprep.subr.mxu0 %v3489_v8  ;;  %p2933_p1 = scmp.ne.s32.totalorder %s4151_s16, 1 }
 0x44c   : > { %s4152_s13 = sld [smem:[#allocation25_spill]] (!%p2933_p1) }
 0x44d   : > { %s4153_s25 = sld [smem:[#allocation23_spill]] (!%p2933_p1) }
 0x451   : > { %v1956_v13 = vpop.xlane.xlu1 %1955 }
 0x452   : > { %3387 = vrcp.f32 %v1956_v13 }
 0x457   : > { %v3386_v14 = vpop.eup %3385 }
 0x458   : > { %v1962_v15 = vmul.f32 %v3386_v14, %v3378_v0  ;;  %v2492_v0 = vld [vmem:[%s3709_s15 + $0x40] sm:$0xff] }
 0x45a   : > { %3212 = vmatmul.mubr.msk.f32.vlgmr.msra.gmra.mxu1 %vm1616_vm3, %v1962_v15 }
 0x45b   : > { %3220 = vmatpush3.msra.mxu1 %v3905_v26  ;;  %3221 = vmatprep.mubr.msk.f32.mxu1 %vm3490_vm2, %v3489_v8  ;;  %v2277_v26 = vld [vmem:[%s3682_s24] sm:$0xff] }
 0x45c   : > { %3235 = vmatprep.subr.mxu1 %v3489_v8  ;;  %3231 = vmatpush3.msra.mxu0 %v2277_v26 }
 0x45d   : > { %3246 = vmatprep.subr.mxu0 %v3489_v8 }
 0x45f   : > { %v3388_v16 = vpop.eup %3387 }
 0x460   : > { %v1964_v17 = vmul.f32 %v3388_v16, %v3380_v3  ;;  %v2490_v3 = vld [vmem:[%s3709_s15 + $0x30] sm:$0xff] }
 0x462   : > { %3222 = vmatmul.mubr.msk.f32.vlgmr.msra.gmra.mxu1 %vm1616_vm3, %v1964_v17 }
 0x463   : > { %3243 = vmatprep.mubr.msk.f32.mxu1 %vm3490_vm2, %v3489_v8  ;;  %3236 = vmatpush3.msra.mxu1 %v2394_v45 }
 0x464   : > { %3237 = vmatprep.subr.mxu1 %v3489_v8 }
 0x465   : > { %3238 = vmatpush3.msra.mxu1 %v2393_v46 }
 0x466   : > { %3239 = vmatprep.subr.mxu1 %v3489_v8 }
 0x4f5   : > { %v2034_v18 = vpop.f32.mrf.mxu0 }
 0x4f6   : > { %2257 = vst.msk [vmem:[#allocation3] sm:$0xff] %vm1616_vm3, %v2034_v18 }
 0x4f7   : > { %v3208_v19 = vpop.f32.mrf.mxu0 }
 0x505   : > { %v2180_v20 = vpop.f32.mrf.mxu0 }
 0x506   : > { %2265 = vrot.lane.b32.xlu1 %v2180_v20, %s3491_s29 }
 0x507   : > { %v3218_v21 = vpop.f32.mrf.mxu0 }
 0x51a   : > { %v2107_v25 = vpop.f32.mrf.mxu1 }
 0x51b   : > { %2259 = vrot.lane.b32.xlu0 %v2107_v25, %s3492_s21 }
 0x51c   : > { %v3213_v27 = vpop.f32.mrf.mxu1 }
 0x522   : > { %v2253_v28 = vpop.f32.mrf.mxu1 }
 0x523   : > { %2271 = vrot.lane.b32.xlu1 %v2253_v28, %s3493_s17 }
 0x524   : > { %v3223_v29 = vpop.f32.mrf.mxu1 }
 0x578   : > { %v2266_v31 = vpop.permute.xlu1 %2265 }
 0x58d   : > { %v2260_v30 = vpop.permute.xlu0 %2259 }
 0x58e   : > { %2263 = vst.msk [vmem:[#allocation3] sm:$0xff] %vm2262_vm5, %v2260_v30 }
 0x58f   : > { %2269 = vst.msk [vmem:[#allocation3] sm:$0xff] %vm2268_vm6, %v2266_v31 }
 0x595   : > { %v2272_v32 = vpop.permute.xlu1 %2271 }
 0x596   : > { %2275 = vst.msk [vmem:[#allocation3] sm:$0xff] %vm2274_vm7, %v2272_v32 }
 0x59d   : > { %v2276_v33 = vld [vmem:[#allocation3] sm:$0xff] }
 0x59e   : > { %3233 = vmatmul.mubr.msk.f32.vlgmr.msra.gmra.mxu0 %vm696_vm1, %v2276_v33 }
 0x59f   : > { %3278 = vmatprep.mubr.msk.f32.mxu0 %vm3490_vm2, %v3489_v8  ;;  %3247 = vmatpush3.msra.mxu0 %v2499_v57 }
 0x5a0   : > { %3248 = vmatprep.subr.mxu0 %v3489_v8 }
 0x5a1   : > { %3249 = vmatpush3.msra.mxu0 %v2498_v58 }
 0x5a2   : > { %3250 = vmatprep.subr.mxu0 %v3489_v8 }
 0x5a3   : > { %3251 = vmatpush3.msra.mxu0 %v2497_v59 }
 0x5a4   : > { %3252 = vmatprep.subr.mxu0 %v3489_v8 }
 0x5a5   : > { %3253 = vmatpush3.msra.mxu0 %v2496_v60 }
 0x5a6   : > { %3254 = vmatprep.subr.mxu0 %v3489_v8 }
 0x5a7   : > { %3255 = vmatpush3.msra.mxu0 %v2495_v61 }
 0x5a8   : > { %3256 = vmatprep.subr.mxu0 %v3489_v8 }
 0x5a9   : > { %3257 = vmatpush3.msra.mxu0 %v2494_v62 }
 0x5aa   : > { %3258 = vmatprep.subr.mxu0 %v3489_v8 }
 0x5ab   : > { %3259 = vmatpush3.msra.mxu0 %v2493_v63 }
 0x5ac   : > { %3260 = vmatprep.subr.mxu0 %v3489_v8 }
 0x5ad   : > { %3261 = vmatpush3.msra.mxu0 %v2492_v0 }
 0x5ae   : > { %3262 = vmatprep.subr.mxu0 %v3489_v8 }
 0x5af   : > { %3263 = vmatpush3.msra.mxu0 %v2491_v2 }
 0x5b0   : > { %3264 = vmatprep.subr.mxu0 %v3489_v8 }
 0x5b1   : > { %3265 = vmatpush3.msra.mxu0 %v2490_v3 }
 0x5b2   : > { %3266 = vmatprep.subr.mxu0 %v3489_v8 }
 0x5b3   : > { %3267 = vmatpush3.msra.mxu0 %v2489_v4 }
 0x5b4   : > { %3268 = vmatprep.subr.mxu0 %v3489_v8 }
 0x5b5   : > { %3269 = vmatpush3.msra.mxu0 %v2488_v5 }
 0x5b6   : > { %3270 = vmatprep.subr.mxu0 %v3489_v8 }
 0x5b7   : > { %3271 = vmatpush3.msra.mxu0 %v2487_v6 }
 0x5b8   : > { %3272 = vmatprep.subr.mxu0 %v3489_v8 }
 0x5b9   : > { %3273 = vmatpush3.msra.mxu0 %v2486_v7 }
 0x5ba   : > { %3274 = vmatprep.subr.mxu0 %v3489_v8 }
 0x5bb   : > { %3275 = vmatpush3.msra.mxu0 %v2485_v9 }
 0x5bc   : > { %3276 = vmatprep.subr.mxu0 %v3489_v8 }
 0x5bd   : > { %3277 = vmatpush3.msra.mxu0 %v2484_v10 }
 0x65e   : > { %v2357_v35 = vpop.f32.mrf.mxu0 }
 0x65f   : > { %v2358_v36 = vadd.f32 %v2926_v34, %v2357_v35 }
 0x660   : > { %v3234_v37 = vpop.f32.mrf.mxu0 }
 0x661   : > { %v3950_v38 = vadd.f32 %v2358_v36, %v3713_v1  ;;  %v2392_v1 = vld [vmem:[%s3695_s14 + $0x8] sm:$0xff]  ;;  %s4154_s14 = sld [smem:[#allocation24_spill]] (!%p2933_p1) }
 0x662   : > { %3240 = vmatpush3.msra.mxu1 %v2392_v1 }
 0x663   : > { %v2364_v39 = vsel %vm696_vm1, %v3950_v38, 0.0  ;;  %3241 = vmatprep.subr.mxu1 %v3489_v8 }
 0x664   : > { %2365 = vadd.xlane.f32.xlu1 %v2364_v39  ;;  %3242 = vmatpush3.msra.mxu1 %v2391_v47 }
 0x6ed   : > { %v2366_v40 = vpop.xlane.xlu1 %2365 }
 0x6ee   : > { %v2367_v41 = vmul.f32 0.03125, %v2366_v40 }
 0x6f0   : > { %v2368_v42 = vsub.f32 %v3950_v38, %v2367_v41 }
 0x6f2   : > { %v2369_v43 = vmul.f32 %v2368_v42, %v2368_v42 }
 0x6f4   : > { %v2370_v44 = vsel %vm696_vm1, %v2369_v43, 0.0 }
 0x6f5   : > { %2371 = vadd.xlane.f32.xlu0 %v2370_v44 }
 0x77e   : > { %v2372_v48 = vpop.xlane.xlu0 %2371 }
 0x77f   : > { %v2373_v49 = vmul.f32 0.03125, %v2372_v48 }
 0x781   : > { %v2374_v50 = vadd.f32 1e-05, %v2373_v49 }
 0x783   : > { %3389 = vrsqrt.f32 %v2374_v50 }
 0x790   : > { %v3390_v51 = vpop.eup %3389 }
 0x791   : > { %v2376_v53 = vmul.f32 %v3390_v51, %v2368_v42 }
 0x793   : > { %v2383_v55 = vmul.f32 %v2928_v52, %v2376_v53 }
 0x795   : > { %v2390_v56 = vadd.f32 %v2929_v54, %v2383_v55 }
 0x797   : > { %3244 = vmatmul.mubr.msk.f32.vlgmr.msra.gmra.mxu1 %vm696_vm1, %v2390_v56 }
 0x857   : > { %v2471_v12 = vpop.f32.mrf.mxu1 }
 0x858   : > { %v2472_v13 = vadd.f32 %v2930_v11, %v2471_v12 }
 0x859   : > { %v3245_v14 = vpop.f32.mrf.mxu1 }
 0x85a   : > { %v2476_v15 = vmul.f32 0.044715, %v2472_v13  ;;  %v2475_v21 = vmul.f32 0.5, %v2472_v13 }
 0x85c   : > { %v2477_v16 = vmul.f32 %v2476_v15, %v2472_v13 }
 0x85e   : > { %v2478_v17 = vmul.f32 %v2477_v16, %v2472_v13 }
 0x860   : > { %v2479_v18 = vadd.f32 %v2478_v17, %v2472_v13 }
 0x862   : > { %v2480_v19 = vmul.f32 0.7978846, %v2479_v18 }
 0x864   : > { %3391 = vtanh.f32 %v2480_v19 }
 0x871   : > { %v3392_v20 = vpop.eup %3391 }
 0x872   : > { %v2482_v22 = vadd.f32 1.0, %v3392_v20 }
 0x874   : > { %v2483_v8 = vmul.f32 %v2482_v22, %v2475_v21 }
 0x876   : > { %3279 = vmatmul.mubr.f32.vlgmr.msra.gmra.mxu0 %v2483_v8 }
 0x936   : > { %v2573_v24 = vpop.f32.mrf.mxu0 }
 0x937   : > { %v2574_v25 = vadd.f32 %v2932_v23, %v2573_v24  ;;  %2582 = sbr.rel (%p2933_p1) target bundleno = 2867 (0xb33), region = 88 }
 0x938   : > { %v3280_v26 = vpop.f32.mrf.mxu0 }
 0x939   : > { %v2577_v27 = vadd.f32 %v2574_v25, %v3950_v38 }
 0x93b   : > { %2578 = vst.msk [vmem:[#allocation2] sm:$0xff] %vm696_vm1, %v2577_v27 }
 0x93c   : > { %v2585_v28 = vsel %vm696_vm1, %v2577_v27, 0.0  ;;  %v2615_v34 = vld [vmem:[%s4152_s13 + $0x18] sm:$0xff]  ;;  %v3494_v35 = vmov 0.0   ;;  %v2614_v36 = vld [vmem:[%s4152_s13 + $0x10] sm:$0xff]  ;;  %vm3495_vm8 = vmmov 0   ;;  %v2613_v37 = vld [vmem:[%s4152_s13 + $0x8] sm:$0xff] }
 0x93d   : > { %2586 = vadd.xlane.f32.xlu0 %v2585_v28  ;;  %3281 = vmatprep.subr.mxu0 %v3494_v35  ;;  %v2612_v38 = vld [vmem:[%s4152_s13] sm:$0xff] }
 0x93e   : > { %3289 = vmatprep.mubr.msk.f32.mxu0 %vm3495_vm8, %v3494_v35  ;;  %3282 = vmatpush3.msra.mxu0 %v2615_v34  ;;  %v2934_v43 = vld [vmem:[%s4153_s25] ss:$0 sm:$0xff] }
 0x93f   : > { %3283 = vmatprep.subr.mxu0 %v3494_v35  ;;  %v2935_v45 = vld [vmem:[%s4154_s14] ss:$0 sm:$0xff] }
 0x940   : > { %3284 = vmatpush3.msra.mxu0 %v2614_v36 }
 0x941   : > { %3285 = vmatprep.subr.mxu0 %v3494_v35 }
 0x942   : > { %3286 = vmatpush3.msra.mxu0 %v2613_v37 }
 0x943   : > { %3287 = vmatprep.subr.mxu0 %v3494_v35 }
 0x944   : > { %3288 = vmatpush3.msra.mxu0 %v2612_v38 }
 0x9c6   : > { %v2587_v29 = vpop.xlane.xlu0 %2586 }
 0x9c7   : > { %v2588_v30 = vmul.f32 0.03125, %v2587_v29 }
 0x9c9   : > { %v2589_v31 = vsub.f32 %v2577_v27, %v2588_v30 }
 0x9cb   : > { %v2590_v32 = vmul.f32 %v2589_v31, %v2589_v31 }
 0x9cd   : > { %v2591_v33 = vsel %vm696_vm1, %v2590_v32, 0.0 }
 0x9ce   : > { %2592 = vadd.xlane.f32.xlu0 %v2591_v33 }
 0xa57   : > { %v2593_v39 = vpop.xlane.xlu0 %2592 }
 0xa58   : > { %v2594_v40 = vmul.f32 0.03125, %v2593_v39 }
 0xa5a   : > { %v2595_v41 = vadd.f32 1e-05, %v2594_v40 }
 0xa5c   : > { %3393 = vrsqrt.f32 %v2595_v41 }
 0xa69   : > { %v3394_v42 = vpop.eup %3393 }
 0xa6a   : > { %v2597_v44 = vmul.f32 %v3394_v42, %v2589_v31 }
 0xa6c   : > { %v2604_v46 = vmul.f32 %v2934_v43, %v2597_v44 }
 0xa6e   : > { %v2611_v1 = vadd.f32 %v2935_v45, %v2604_v46 }
 0xa70   : > { %3290 = vmatmul.mubr.msk.f32.vlgmr.msra.gmra.mxu0 %vm696_vm1, %v2611_v1 }
 0xb30   : > { %v2685_v47 = vpop.f32.mrf.mxu0 }
 0xb31   : > { %2689 = vst [vmem:[%s634_s30] sm:$0xff] %v2685_v47 }
 0xb32   : > { %v3291_v48 = vpop.f32.mrf.mxu0 }
 0xb33 PF: > { %s4155_s0 = sld [smem:[#allocation11_spill]]  ;;  %s2704_s21 = sshll.u32 %s634_s30, 4  ;;  %s2705_s21 = int_to_ptr.vmem [resolvable:$true] %s2704_s21 }
 0xb34   : > { %s4156_s27 = sld [smem:[#allocation8_spill]]  ;;  %s3395_s26 = scalar_lea.vmem %s2705_s21, 128 }
 0xb35   : > { %s4158_s18 = sld [smem:[#allocation26_spill]]  ;;  %p3396_p2 = scmp.ne.s32.totalorder %s2705_s21, %s3395_s26 }
 0xb36   : > { %s3496_s20 = smov [#allocation4]  }
 0xb37   : > { %p3397_p4 = pnand %p3396_p2, %p3626_p3  ;;  %s3399_s28 = sshll.u32 %s3496_s20, 4  ;;  %s3400_s28 = int_to_ptr.vmem [resolvable:$false] %s3399_s28 }
 0xb38   : > { %s3401_s25 = scalar_lea.vmem %s3400_s28, 256  ;;  %p3402_p6 = scmp.lt.s32.totalorder %s2705_s21, %s3400_s28 }
 0xb39   : > { %s2938_s12 = sshll.u32 %s4155_s0, 7  ;;  %p3398_p5 = pneg %p3397_p4 }
 0xb3a   : > { %s4160_s17 = sand.u32 1, %s4156_s27   ;;  %p3403_p7 = scmp.lt.s32.totalorder %s3401_s25, %s3395_s26 }
 0xb3b   : > { %s4159_s29 = smov %s4158_s18  ;;  %s2702_s19 = scalar_lea.hbm %s4158_s18, %s2938_s12 }
 0xb3c   : > { %s2691_s24 = scalar_lea.sflag [#allocation5], %s4160_s17  ;;  %p3404_p8 = por %p3403_p7, %p3402_p6 }
 0xb3e   : > { %p3405_p10 = pnand %p3404_p8, %p3398_p5 }
 0xb40   : > { %3408 = shalt.err (!%p3405_p10)
}
 0xb41   : > { %s3409_s3 = scalar_lea.hbm %s2702_s19, 128  ;;  %s3413_s22 = scalar_lea.hbm %s4159_s29, 256 }
 0xb42   : > { %p3410_p11 = scmp.ne.s32.totalorder %s2702_s19, %s3409_s3  ;;  %p3414_p0 = scmp.lt.s32.totalorder %s2702_s19, %s4159_s29 }
 0xb43   : > { %p3415_p1 = scmp.lt.s32.totalorder %s3413_s22, %s3409_s3 }
 0xb44   : > { %p3411_p12 = pnand %p3410_p11, %p3626_p3 }
 0xb45   : > { %p3416_p2 = por %p3415_p1, %p3414_p0 }
 0xb46   : > { %p3412_p13 = pneg %p3411_p12 }
 0xb48   : > { %p3417_p4 = pnand %p3416_p2, %p3412_p13 }
 0xb4a   : > { %3420 = shalt.err (!%p3417_p4)
}
 0xb4b   : > { %3293 = dma.vmem_to_hbm [thread:$0]  (%p3626_p3), %s2705_s21, 128, %s2702_s19, %s2691_s24  }
 0xb4c PF: > { %s4161_s27 = sld [smem:[#allocation14_spill]] }
 0xb4d   : > { %s4162_s12 = sld [smem:[#allocation7_spill]] }
 0xb52   : > { %p3299_p5 = scmp.ge.s32.totalorder %s4161_s27, 2 }
 0xb53   : > { %s2716_s4 = sand.u32 1, %s4162_s12  }
 0xb54   : > { %p3296_p6 = pnand %p3299_p5, %p3636_p9  ;;  %s2717_s18 = scalar_lea.sflag [#allocation5], %s2716_s4 }
 0xb56   : > { %p3297_p7 = pneg %p3296_p6 }
 0xb58   : > { %3454 = dma.done.wait (%p3297_p7), %s2717_s18, 128  }
 0xb59   : > { %3456 = vsyncadd (%p3297_p7), %s2717_s18, 4294967168  ;;  %s28_s25 = sadd.s32 1, %s4161_s27   ;;  %s4164_s18 = sld [smem:[#allocation8_spill]] }
 0xb5a   : > { %p25_p8 = scmp.ge.s32.totalorder %s28_s25, 6   ;;  %s4165_s19 = sld [smem:[#allocation9_spill]] }
 0xb5b   : > { %s4166_s20 = sld [smem:[#allocation19_spill]] }
 0xb5c   : > { %s4167_s21 = sld [smem:[#allocation12_spill]]  ;;  %27 = sbr.rel (!%p25_p8) target bundleno = 13 (0xd), region = 156 }
 0xb5d   : > { %s4168_s22 = sld [smem:[#allocation13_spill]] }
 0xb5e   : > { %s4169_s23 = sld [smem:[#allocation15_spill]] }
 0xb5f   : > { %s4170_s24 = sld [smem:[#allocation17_spill]] }
 0xb61   :  { %2722 = vsyncpa [#allocation5], 1 }
 0xb62   :  { %2724 = vsyncpa [#allocation5 + $0x1], 1 }

</bundles_post_ra>
